<compile_context>
chip_gen: v7x
topology: tpu7x:2x2x1
jax: 0.10.0
libtpu: 0.0.40
codegen_flags: <defaults>
</compile_context>

<pallas_src>
import numpy as np
import jax
import jax.numpy as jnp
from jax.experimental import pallas as pl
from jax.experimental.pallas import tpu as pltpu

FEAT = 19           # feat_size
HID = FEAT // 2     # int(feat_size / 2) = 9  (edge MLP hidden)
GATHER = 64         # gather_width
K = 2               # k propagation steps


def _softsign(x):
    return x / (1.0 + jnp.abs(x))


# ---------------------------------------------------------------------------
# Pallas kernel: the whole forward (message passing, GRU, attention) runs in VMEM.
# The data-dependent gather/scatter over edges is expressed as two dense one-hot
# matmuls (G_src @ m and S_dst @ msg) in bf16 so the hot path is MXU matmuls.
# ---------------------------------------------------------------------------
def _potentialnet_kernel(
    h0_ref, eattr_ref, gsrc_ref, sdst_ref,
    ew1_ref, eb1_ref, ew2_ref, eb2_ref,
    whcat_ref, wihcat_ref, bih_ref, bhh_ref, nnb_ref,
    wi1_ref, bi1_ref, wi2_ref, bi2_ref, wj_ref, bj_ref,
    out_ref,
):
    f32 = jnp.float32
    bf16 = jnp.bfloat16
    F = FEAT

    h0 = h0_ref[...]                                    # [N, F]

    # edge_network_nn: Linear(1->9) . Softsign . Linear(9->19) . Softsign
    e = eattr_ref[...]                                  # [E, 1]
    t = _softsign(e * ew1_ref[...] + eb1_ref[...])      # [E, HID]  (K=1 matmul as broadcast)
    w_edge = _softsign(
        jnp.dot(t, ew2_ref[...], preferred_element_type=f32) + eb2_ref[...]
    )                                                   # [E, F]

    gsrc = gsrc_ref[...]                                # [E, N] one-hot(src), bf16
    sdst = sdst_ref[...]                                # [N, E] one-hot(dst)^T, bf16

    # Biases / constants loaded once, reused across the unrolled K loop.
    bih = bih_ref[...]                                  # [1, 3F]
    bhh = bhh_ref[...]                                  # [1, 3F]
    nnb = nnb_ref[...]                                  # [1, F]
    wih_cat = wihcat_ref[...]                           # [F, 3F]

    h = h0
    for i in range(K):                                  # static unrolled k=2
        # One fused matmul for every h-side weight of this step:
        #   [:, 0:F]    = h @ wgate[i]              (GatedGraphConv mix)
        #   [:, F:2F]   = h @ (wgate[i] @ root)     (NNConv root term, pre-folded)
        #   [:, 2F:5F]  = h @ whh_cat               (GRU hidden-side gates)
        h_all = jnp.dot(h, whcat_ref[i], preferred_element_type=f32)    # [N, 5F]
        m = h_all[:, :F]                                                # [N, F]
        root_term = h_all[:, F:2 * F]                                   # [N, F]
        gh = h_all[:, 2 * F:] + bhh                                     # [N, 3F]

        # edge-conditioned message passing (bf16 operands -> native MXU path, f32 acc)
        msg = jnp.dot(gsrc, m.astype(bf16), preferred_element_type=f32) * w_edge   # [E, F]
        agg = jnp.dot(sdst, msg.astype(bf16), preferred_element_type=f32)          # [N, F]
        m_new = agg + root_term + nnb                                   # NNConv out

        # torch.nn.GRUCell(m_new, h): one fused input-side matmul, gates as lane slices
        gi = jnp.dot(m_new, wih_cat, preferred_element_type=f32) + bih  # [N, 3F]
        r = jax.nn.sigmoid(gi[:, :F] + gh[:, :F])
        z = jax.nn.sigmoid(gi[:, F:2 * F] + gh[:, F:2 * F])
        n = jnp.tanh(gi[:, 2 * F:] + r * gh[:, 2 * F:])
        h = (1.0 - z) * n + z * h

    # PotentialNetAttention: Softmax(net_i(cat([h1, h0], dim=1)), dim=1) * net_j(h0)
    hcat = jnp.concatenate([h, h0], axis=-1)                            # [N, 2F]
    a = _softsign(
        jnp.dot(hcat, wi1_ref[...], preferred_element_type=f32) + bi1_ref[...])    # [N, F]
    a = _softsign(jnp.dot(a, wi2_ref[...], preferred_element_type=f32) + bi2_ref[...])  # [N, G]
    a = a - jnp.max(a, axis=-1, keepdims=True)
    a = jnp.exp(a)
    att = a * pl.reciprocal(jnp.sum(a, axis=-1, keepdims=True), approx=True)       # softmax dim=1
    nj = _softsign(jnp.dot(h0, wj_ref[...], preferred_element_type=f32) + bj_ref[...])  # [N, G]
    out_ref[...] = att * nj


def potentialnet_forward(data, edge_index, edge_attr, params):
    """data: [N, F] node features; edge_index: [2, E] (src, dst); edge_attr: [E, 1]."""
    (ew1, eb1, ew2, eb2, wgate, root, nnb,
     wih, whh, bih, bhh,
     wi1a, wi1b, bi1, wi2, bi2, wj, bj) = params

    N, F = data.shape
    assert F == FEAT
    E = edge_attr.shape[0]
    src, dst = edge_index[0], edge_index[1]

    # Glue (plain JAX): data-dependent gather/scatter as dense one-hot matrices.
    # bf16 keeps 0/1 exact, halves VMEM/DMA bytes and uses the native bf16 MXU path.
    gsrc = jax.nn.one_hot(src, N, dtype=jnp.bfloat16)       # [E, N]
    sdst = jax.nn.one_hot(dst, N, dtype=jnp.bfloat16).T     # [N, E]

    # Wrapper-side weight fusion (runs once under jit; keeps the kernel MXU-lean).
    whh_cat = jnp.concatenate([whh[0], whh[1], whh[2]], axis=1)     # [F, 3F]
    wih_cat = jnp.concatenate([wih[0], wih[1], wih[2]], axis=1)     # [F, 3F]
    bih_cat = jnp.concatenate([bih[0], bih[1], bih[2]], axis=1)     # [1, 3F]
    bhh_cat = jnp.concatenate([bhh[0], bhh[1], bhh[2]], axis=1)     # [1, 3F]
    wh_cat = jnp.stack(
        [jnp.concatenate([wgate[i], wgate[i] @ root, whh_cat], axis=1) for i in range(K)]
    )                                                               # [K, F, 5F]
    wi1 = jnp.concatenate([wi1a, wi1b], axis=0)                     # [2F, F]

    inputs = (
        data.astype(jnp.float32), edge_attr.astype(jnp.float32), gsrc, sdst,
        ew1, eb1, ew2, eb2,
        wh_cat, wih_cat, bih_cat, bhh_cat, nnb,
        wi1, bi1, wi2, bi2, wj, bj,
    )

    vmem_spec = pl.BlockSpec(memory_space=pltpu.MemorySpace.VMEM)
    return pl.pallas_call(
        _potentialnet_kernel,
        out_shape=jax.ShapeDtypeStruct((N, GATHER), jnp.float32),
        in_specs=[vmem_spec] * len(inputs),
        out_specs=vmem_spec,
        compiler_params=pltpu.CompilerParams(vmem_limit_bytes=64 * 1024 * 1024),
    )(*inputs)


# ---------------------------------------------------------------------------
# Deterministic parameter init (synthetic; shapes from PotentialNetPropagation.__init__)
# ---------------------------------------------------------------------------
def init_params(key):
    ks = jax.random.split(key, 18)

    def rnd(k, shape, scale=0.25):
        return (scale * jax.random.normal(k, shape)).astype(jnp.float32)

    ew1 = rnd(ks[0], (1, HID))           # edge MLP Linear(1 -> 9)  (weight^T)
    eb1 = rnd(ks[1], (1, HID))
    ew2 = rnd(ks[2], (HID, FEAT))        # edge MLP Linear(9 -> 19)
    eb2 = rnd(ks[3], (1, FEAT))
    wgate = rnd(ks[4], (K, FEAT, FEAT))  # GatedGraphConv per-step weight
    root = rnd(ks[5], (FEAT, FEAT))      # NNConv root weight
    nnb = rnd(ks[6], (1, FEAT))          # NNConv bias
    wih = rnd(ks[7], (3, FEAT, FEAT))    # GRUCell W_ih (r, z, n), transposed
    whh = rnd(ks[8], (3, FEAT, FEAT))    # GRUCell W_hh (r, z, n), transposed
    bih = rnd(ks[9], (3, 1, FEAT))
    bhh = rnd(ks[10], (3, 1, FEAT))
    wi1a = rnd(ks[11], (FEAT, FEAT))     # attention net_i Linear(2F -> F): h1 half
    wi1b = rnd(ks[12], (FEAT, FEAT))     #                                 h0 half
    bi1 = rnd(ks[13], (1, FEAT))
    wi2 = rnd(ks[14], (FEAT, GATHER))    # attention net_i Linear(F -> G)
    bi2 = rnd(ks[15], (1, GATHER))
    wj = rnd(ks[16], (FEAT, GATHER))     # attention net_j Linear(F -> G)
    bj = rnd(ks[17], (1, GATHER))

    return (ew1, eb1, ew2, eb2, wgate, root, nnb,
            wih, whh, bih, bhh,
            wi1a, wi1b, bi1, wi2, bi2, wj, bj)


# ---------------------------------------------------------------------------
# Pure-JAX reference (same math, fp32, no fusion) for a correctness check.
# ---------------------------------------------------------------------------
def reference_forward(data, edge_index, edge_attr, params):
    (ew1, eb1, ew2, eb2, wgate, root, nnb,
     wih, whh, bih, bhh,
     wi1a, wi1b, bi1, wi2, bi2, wj, bj) = params
    N = data.shape[0]
    src, dst = edge_index[0], edge_index[1]
    gsrc = jax.nn.one_hot(src, N, dtype=jnp.float32)
    sdst = jax.nn.one_hot(dst, N, dtype=jnp.float32).T

    h0 = data
    w_edge = _softsign(_softsign(edge_attr * ew1 + eb1) @ ew2 + eb2)
    h = h0
    for i in range(K):
        m = h @ wgate[i]
        msg = (gsrc @ m) * w_edge
        m = sdst @ msg + m @ root + nnb
        r = jax.nn.sigmoid(m @ wih[0] + bih[0] + h @ whh[0] + bhh[0])
        z = jax.nn.sigmoid(m @ wih[1] + bih[1] + h @ whh[1] + bhh[1])
        n = jnp.tanh(m @ wih[2] + bih[2] + r * (h @ whh[2] + bhh[2]))
        h = (1.0 - z) * n + z * h
    a = _softsign(h @ wi1a + h0 @ wi1b + bi1)
    a = jax.nn.softmax(_softsign(a @ wi2 + bi2), axis=1)
    return a * _softsign(h0 @ wj + bj)


if __name__ == "__main__":
    key = jax.random.PRNGKey(0)
    k_data, k_src, k_dst, k_ea, k_par = jax.random.split(key, 5)

    N, E = 16, 32
    data = jax.random.normal(k_data, (N, FEAT), jnp.float32)            # node features [N, 19]
    src = jax.random.randint(k_src, (E,), 0, N)
    dst = jax.random.randint(k_dst, (E,), 0, N)
    edge_index = jnp.stack([src, dst])                                   # [2, E]
    edge_attr = jax.random.uniform(k_ea, (E, 1), jnp.float32, 0.5, 4.0)  # [E, 1] distances

    params = init_params(k_par)

    out = potentialnet_forward(data, edge_index, edge_attr, params)
    out = jax.block_until_ready(out)

    ref = reference_forward(data, edge_index, edge_attr, params)
    err = float(jnp.max(jnp.abs(out - ref)))

    assert out.shape == (N, GATHER), out.shape
    assert np.isfinite(np.asarray(out)).all()
    assert err < 5e-2, f"mismatch vs reference: {err}"
    print("KERNEL_OK")
</pallas_src>

<mosaic_0001>
module attributes {stable_mosaic.version = 11 : i64} {
  func.func @_potentialnet_kernel(%arg0: memref<16x19xf32, #tpu.memory_space<vmem>>, %arg1: memref<32x1xf32, #tpu.memory_space<vmem>>, %arg2: memref<32x16xbf16, #tpu.memory_space<vmem>>, %arg3: memref<16x32xbf16, #tpu.memory_space<vmem>>, %arg4: memref<1x9xf32, #tpu.memory_space<vmem>>, %arg5: memref<1x9xf32, #tpu.memory_space<vmem>>, %arg6: memref<9x19xf32, #tpu.memory_space<vmem>>, %arg7: memref<1x19xf32, #tpu.memory_space<vmem>>, %arg8: memref<2x19x95xf32, #tpu.memory_space<vmem>>, %arg9: memref<19x57xf32, #tpu.memory_space<vmem>>, %arg10: memref<1x57xf32, #tpu.memory_space<vmem>>, %arg11: memref<1x57xf32, #tpu.memory_space<vmem>>, %arg12: memref<1x19xf32, #tpu.memory_space<vmem>>, %arg13: memref<38x19xf32, #tpu.memory_space<vmem>>, %arg14: memref<1x19xf32, #tpu.memory_space<vmem>>, %arg15: memref<19x64xf32, #tpu.memory_space<vmem>>, %arg16: memref<1x64xf32, #tpu.memory_space<vmem>>, %arg17: memref<19x64xf32, #tpu.memory_space<vmem>>, %arg18: memref<1x64xf32, #tpu.memory_space<vmem>>, %arg19: memref<16x64xf32, #tpu.memory_space<vmem>>) attributes {dimension_semantics = [], scalar_prefetch = 0 : i64, scratch_operands = 0 : i64, tpu.core_type = #tpu.core_type<tc>} {
    %c0 = arith.constant 0 : index
    %c0_0 = arith.constant 0 : index
    %0 = vector.load %arg0[%c0, %c0_0] : memref<16x19xf32, #tpu.memory_space<vmem>>, vector<16x19xf32>
    %c0_1 = arith.constant 0 : index
    %c0_2 = arith.constant 0 : index
    %1 = vector.load %arg1[%c0_1, %c0_2] : memref<32x1xf32, #tpu.memory_space<vmem>>, vector<32x1xf32>
    %c0_3 = arith.constant 0 : index
    %c0_4 = arith.constant 0 : index
    %2 = vector.load %arg4[%c0_3, %c0_4] : memref<1x9xf32, #tpu.memory_space<vmem>>, vector<1x9xf32>
    %3 = vector.broadcast %1 : vector<32x1xf32> to vector<32x9xf32>
    %4 = vector.broadcast %2 : vector<1x9xf32> to vector<32x9xf32>
    %5 = arith.mulf %3, %4 : vector<32x9xf32>
    %c0_5 = arith.constant 0 : index
    %c0_6 = arith.constant 0 : index
    %6 = vector.load %arg5[%c0_5, %c0_6] : memref<1x9xf32, #tpu.memory_space<vmem>>, vector<1x9xf32>
    %7 = vector.broadcast %6 : vector<1x9xf32> to vector<32x9xf32>
    %8 = arith.addf %5, %7 : vector<32x9xf32>
    %9 = math.absf %8 : vector<32x9xf32>
    %cst = arith.constant 1.000000e+00 : f32
    %10 = vector.broadcast %cst : f32 to vector<32x9xf32>
    %11 = arith.addf %10, %9 : vector<32x9xf32>
    %12 = arith.divf %8, %11 : vector<32x9xf32>
    %c0_7 = arith.constant 0 : index
    %c0_8 = arith.constant 0 : index
    %13 = vector.load %arg6[%c0_7, %c0_8] : memref<9x19xf32, #tpu.memory_space<vmem>>, vector<9x19xf32>
    %cst_9 = arith.constant dense<0.000000e+00> : vector<32x19xf32>
    %14 = tpu.matmul %12, %13, %cst_9 {dimension_numbers = #tpu.dot_dimension_numbers<[1], [0], [0], [1], [0, 0, 1, 1], [], []>} : vector<32x9xf32>, vector<9x19xf32>, vector<32x19xf32> -> vector<32x19xf32>
    %c0_10 = arith.constant 0 : index
    %c0_11 = arith.constant 0 : index
    %15 = vector.load %arg7[%c0_10, %c0_11] : memref<1x19xf32, #tpu.memory_space<vmem>>, vector<1x19xf32>
    %16 = vector.broadcast %15 : vector<1x19xf32> to vector<32x19xf32>
    %17 = arith.addf %14, %16 : vector<32x19xf32>
    %18 = math.absf %17 : vector<32x19xf32>
    %cst_12 = arith.constant 1.000000e+00 : f32
    %19 = vector.broadcast %cst_12 : f32 to vector<32x19xf32>
    %20 = arith.addf %19, %18 : vector<32x19xf32>
    %21 = arith.divf %17, %20 : vector<32x19xf32>
    %c0_13 = arith.constant 0 : index
    %c0_14 = arith.constant 0 : index
    %22 = vector.load %arg2[%c0_13, %c0_14] : memref<32x16xbf16, #tpu.memory_space<vmem>>, vector<32x16xbf16>
    %c0_15 = arith.constant 0 : index
    %c0_16 = arith.constant 0 : index
    %23 = vector.load %arg3[%c0_15, %c0_16] : memref<16x32xbf16, #tpu.memory_space<vmem>>, vector<16x32xbf16>
    %c0_17 = arith.constant 0 : index
    %c0_18 = arith.constant 0 : index
    %24 = vector.load %arg10[%c0_17, %c0_18] : memref<1x57xf32, #tpu.memory_space<vmem>>, vector<1x57xf32>
    %c0_19 = arith.constant 0 : index
    %c0_20 = arith.constant 0 : index
    %25 = vector.load %arg11[%c0_19, %c0_20] : memref<1x57xf32, #tpu.memory_space<vmem>>, vector<1x57xf32>
    %c0_21 = arith.constant 0 : index
    %c0_22 = arith.constant 0 : index
    %26 = vector.load %arg12[%c0_21, %c0_22] : memref<1x19xf32, #tpu.memory_space<vmem>>, vector<1x19xf32>
    %c0_23 = arith.constant 0 : index
    %c0_24 = arith.constant 0 : index
    %27 = vector.load %arg9[%c0_23, %c0_24] : memref<19x57xf32, #tpu.memory_space<vmem>>, vector<19x57xf32>
    %c0_25 = arith.constant 0 : index
    %c0_26 = arith.constant 0 : index
    %c0_27 = arith.constant 0 : index
    %28 = vector.load %arg8[%c0_25, %c0_26, %c0_27] : memref<2x19x95xf32, #tpu.memory_space<vmem>>, vector<1x19x95xf32>
    %29 = vector.shape_cast %28 : vector<1x19x95xf32> to vector<19x95xf32>
    %cst_28 = arith.constant dense<0.000000e+00> : vector<16x95xf32>
    %30 = tpu.matmul %0, %29, %cst_28 {dimension_numbers = #tpu.dot_dimension_numbers<[1], [0], [0], [1], [0, 0, 1, 1], [], []>} : vector<16x19xf32>, vector<19x95xf32>, vector<16x95xf32> -> vector<16x95xf32>
    %31 = vector.extract_strided_slice %30 {offsets = [0, 0], sizes = [16, 19], strides = [1, 1]} : vector<16x95xf32> to vector<16x19xf32>
    %32 = vector.extract_strided_slice %30 {offsets = [0, 19], sizes = [16, 19], strides = [1, 1]} : vector<16x95xf32> to vector<16x19xf32>
    %33 = vector.extract_strided_slice %30 {offsets = [0, 38], sizes = [16, 57], strides = [1, 1]} : vector<16x95xf32> to vector<16x57xf32>
    %34 = vector.broadcast %25 : vector<1x57xf32> to vector<16x57xf32>
    %35 = arith.addf %33, %34 : vector<16x57xf32>
    %36 = arith.truncf %31 : vector<16x19xf32> to vector<16x19xbf16>
    %cst_29 = arith.constant dense<0.000000e+00> : vector<32x19xf32>
    %37 = tpu.matmul %22, %36, %cst_29 {dimension_numbers = #tpu.dot_dimension_numbers<[1], [0], [0], [1], [0, 0, 1, 1], [], []>} : vector<32x16xbf16>, vector<16x19xbf16>, vector<32x19xf32> -> vector<32x19xf32>
    %38 = arith.mulf %37, %21 : vector<32x19xf32>
    %39 = arith.truncf %38 : vector<32x19xf32> to vector<32x19xbf16>
    %cst_30 = arith.constant dense<0.000000e+00> : vector<16x19xf32>
    %40 = tpu.matmul %23, %39, %cst_30 {dimension_numbers = #tpu.dot_dimension_numbers<[1], [0], [0], [1], [0, 0, 1, 1], [], []>} : vector<16x32xbf16>, vector<32x19xbf16>, vector<16x19xf32> -> vector<16x19xf32>
    %41 = arith.addf %40, %32 : vector<16x19xf32>
    %42 = vector.broadcast %26 : vector<1x19xf32> to vector<16x19xf32>
    %43 = arith.addf %41, %42 : vector<16x19xf32>
    %cst_31 = arith.constant dense<0.000000e+00> : vector<16x57xf32>
    %44 = tpu.matmul %43, %27, %cst_31 {dimension_numbers = #tpu.dot_dimension_numbers<[1], [0], [0], [1], [0, 0, 1, 1], [], []>} : vector<16x19xf32>, vector<19x57xf32>, vector<16x57xf32> -> vector<16x57xf32>
    %45 = vector.broadcast %24 : vector<1x57xf32> to vector<16x57xf32>
    %46 = arith.addf %44, %45 : vector<16x57xf32>
    %47 = vector.extract_strided_slice %46 {offsets = [0, 0], sizes = [16, 19], strides = [1, 1]} : vector<16x57xf32> to vector<16x19xf32>
    %48 = vector.extract_strided_slice %35 {offsets = [0, 0], sizes = [16, 19], strides = [1, 1]} : vector<16x57xf32> to vector<16x19xf32>
    %49 = arith.addf %47, %48 : vector<16x19xf32>
    %50 = arith.negf %49 : vector<16x19xf32>
    %51 = math.exp %50 : vector<16x19xf32>
    %cst_32 = arith.constant 1.000000e+00 : f32
    %52 = vector.broadcast %cst_32 : f32 to vector<16x19xf32>
    %53 = arith.addf %52, %51 : vector<16x19xf32>
    %54 = arith.divf %52, %53 : vector<16x19xf32>
    %55 = vector.extract_strided_slice %46 {offsets = [0, 19], sizes = [16, 19], strides = [1, 1]} : vector<16x57xf32> to vector<16x19xf32>
    %56 = vector.extract_strided_slice %35 {offsets = [0, 19], sizes = [16, 19], strides = [1, 1]} : vector<16x57xf32> to vector<16x19xf32>
    %57 = arith.addf %55, %56 : vector<16x19xf32>
    %58 = arith.negf %57 : vector<16x19xf32>
    %59 = math.exp %58 : vector<16x19xf32>
    %cst_33 = arith.constant 1.000000e+00 : f32
    %60 = vector.broadcast %cst_33 : f32 to vector<16x19xf32>
    %61 = arith.addf %60, %59 : vector<16x19xf32>
    %62 = arith.divf %60, %61 : vector<16x19xf32>
    %63 = vector.extract_strided_slice %46 {offsets = [0, 38], sizes = [16, 19], strides = [1, 1]} : vector<16x57xf32> to vector<16x19xf32>
    %64 = vector.extract_strided_slice %35 {offsets = [0, 38], sizes = [16, 19], strides = [1, 1]} : vector<16x57xf32> to vector<16x19xf32>
    %65 = arith.mulf %54, %64 : vector<16x19xf32>
    %66 = arith.addf %63, %65 : vector<16x19xf32>
    %67 = math.tanh %66 : vector<16x19xf32>
    %cst_34 = arith.constant 1.000000e+00 : f32
    %68 = vector.broadcast %cst_34 : f32 to vector<16x19xf32>
    %69 = arith.subf %68, %62 : vector<16x19xf32>
    %70 = arith.mulf %69, %67 : vector<16x19xf32>
    %71 = arith.mulf %62, %0 : vector<16x19xf32>
    %72 = arith.addf %70, %71 : vector<16x19xf32>
    %c1 = arith.constant 1 : index
    %c0_35 = arith.constant 0 : index
    %c0_36 = arith.constant 0 : index
    %73 = vector.load %arg8[%c1, %c0_35, %c0_36] : memref<2x19x95xf32, #tpu.memory_space<vmem>>, vector<1x19x95xf32>
    %74 = vector.shape_cast %73 : vector<1x19x95xf32> to vector<19x95xf32>
    %cst_37 = arith.constant dense<0.000000e+00> : vector<16x95xf32>
    %75 = tpu.matmul %72, %74, %cst_37 {dimension_numbers = #tpu.dot_dimension_numbers<[1], [0], [0], [1], [0, 0, 1, 1], [], []>} : vector<16x19xf32>, vector<19x95xf32>, vector<16x95xf32> -> vector<16x95xf32>
    %76 = vector.extract_strided_slice %75 {offsets = [0, 0], sizes = [16, 19], strides = [1, 1]} : vector<16x95xf32> to vector<16x19xf32>
    %77 = vector.extract_strided_slice %75 {offsets = [0, 19], sizes = [16, 19], strides = [1, 1]} : vector<16x95xf32> to vector<16x19xf32>
    %78 = vector.extract_strided_slice %75 {offsets = [0, 38], sizes = [16, 57], strides = [1, 1]} : vector<16x95xf32> to vector<16x57xf32>
    %79 = vector.broadcast %25 : vector<1x57xf32> to vector<16x57xf32>
    %80 = arith.addf %78, %79 : vector<16x57xf32>
    %81 = arith.truncf %76 : vector<16x19xf32> to vector<16x19xbf16>
    %cst_38 = arith.constant dense<0.000000e+00> : vector<32x19xf32>
    %82 = tpu.matmul %22, %81, %cst_38 {dimension_numbers = #tpu.dot_dimension_numbers<[1], [0], [0], [1], [0, 0, 1, 1], [], []>} : vector<32x16xbf16>, vector<16x19xbf16>, vector<32x19xf32> -> vector<32x19xf32>
    %83 = arith.mulf %82, %21 : vector<32x19xf32>
    %84 = arith.truncf %83 : vector<32x19xf32> to vector<32x19xbf16>
    %cst_39 = arith.constant dense<0.000000e+00> : vector<16x19xf32>
    %85 = tpu.matmul %23, %84, %cst_39 {dimension_numbers = #tpu.dot_dimension_numbers<[1], [0], [0], [1], [0, 0, 1, 1], [], []>} : vector<16x32xbf16>, vector<32x19xbf16>, vector<16x19xf32> -> vector<16x19xf32>
    %86 = arith.addf %85, %77 : vector<16x19xf32>
    %87 = vector.broadcast %26 : vector<1x19xf32> to vector<16x19xf32>
    %88 = arith.addf %86, %87 : vector<16x19xf32>
    %cst_40 = arith.constant dense<0.000000e+00> : vector<16x57xf32>
    %89 = tpu.matmul %88, %27, %cst_40 {dimension_numbers = #tpu.dot_dimension_numbers<[1], [0], [0], [1], [0, 0, 1, 1], [], []>} : vector<16x19xf32>, vector<19x57xf32>, vector<16x57xf32> -> vector<16x57xf32>
    %90 = vector.broadcast %24 : vector<1x57xf32> to vector<16x57xf32>
    %91 = arith.addf %89, %90 : vector<16x57xf32>
    %92 = vector.extract_strided_slice %91 {offsets = [0, 0], sizes = [16, 19], strides = [1, 1]} : vector<16x57xf32> to vector<16x19xf32>
    %93 = vector.extract_strided_slice %80 {offsets = [0, 0], sizes = [16, 19], strides = [1, 1]} : vector<16x57xf32> to vector<16x19xf32>
    %94 = arith.addf %92, %93 : vector<16x19xf32>
    %95 = arith.negf %94 : vector<16x19xf32>
    %96 = math.exp %95 : vector<16x19xf32>
    %cst_41 = arith.constant 1.000000e+00 : f32
    %97 = vector.broadcast %cst_41 : f32 to vector<16x19xf32>
    %98 = arith.addf %97, %96 : vector<16x19xf32>
    %99 = arith.divf %97, %98 : vector<16x19xf32>
    %100 = vector.extract_strided_slice %91 {offsets = [0, 19], sizes = [16, 19], strides = [1, 1]} : vector<16x57xf32> to vector<16x19xf32>
    %101 = vector.extract_strided_slice %80 {offsets = [0, 19], sizes = [16, 19], strides = [1, 1]} : vector<16x57xf32> to vector<16x19xf32>
    %102 = arith.addf %100, %101 : vector<16x19xf32>
    %103 = arith.negf %102 : vector<16x19xf32>
    %104 = math.exp %103 : vector<16x19xf32>
    %cst_42 = arith.constant 1.000000e+00 : f32
    %105 = vector.broadcast %cst_42 : f32 to vector<16x19xf32>
    %106 = arith.addf %105, %104 : vector<16x19xf32>
    %107 = arith.divf %105, %106 : vector<16x19xf32>
    %108 = vector.extract_strided_slice %91 {offsets = [0, 38], sizes = [16, 19], strides = [1, 1]} : vector<16x57xf32> to vector<16x19xf32>
    %109 = vector.extract_strided_slice %80 {offsets = [0, 38], sizes = [16, 19], strides = [1, 1]} : vector<16x57xf32> to vector<16x19xf32>
    %110 = arith.mulf %99, %109 : vector<16x19xf32>
    %111 = arith.addf %108, %110 : vector<16x19xf32>
    %112 = math.tanh %111 : vector<16x19xf32>
    %cst_43 = arith.constant 1.000000e+00 : f32
    %113 = vector.broadcast %cst_43 : f32 to vector<16x19xf32>
    %114 = arith.subf %113, %107 : vector<16x19xf32>
    %115 = arith.mulf %114, %112 : vector<16x19xf32>
    %116 = arith.mulf %107, %72 : vector<16x19xf32>
    %117 = arith.addf %115, %116 : vector<16x19xf32>
    %118 = tpu.concatenate %117, %0 in 1 : vector<16x19xf32>, vector<16x19xf32> -> vector<16x38xf32>
    %c0_44 = arith.constant 0 : index
    %c0_45 = arith.constant 0 : index
    %119 = vector.load %arg13[%c0_44, %c0_45] : memref<38x19xf32, #tpu.memory_space<vmem>>, vector<38x19xf32>
    %cst_46 = arith.constant dense<0.000000e+00> : vector<16x19xf32>
    %120 = tpu.matmul %118, %119, %cst_46 {dimension_numbers = #tpu.dot_dimension_numbers<[1], [0], [0], [1], [0, 0, 1, 1], [], []>} : vector<16x38xf32>, vector<38x19xf32>, vector<16x19xf32> -> vector<16x19xf32>
    %c0_47 = arith.constant 0 : index
    %c0_48 = arith.constant 0 : index
    %121 = vector.load %arg14[%c0_47, %c0_48] : memref<1x19xf32, #tpu.memory_space<vmem>>, vector<1x19xf32>
    %122 = vector.broadcast %121 : vector<1x19xf32> to vector<16x19xf32>
    %123 = arith.addf %120, %122 : vector<16x19xf32>
    %124 = math.absf %123 : vector<16x19xf32>
    %cst_49 = arith.constant 1.000000e+00 : f32
    %125 = vector.broadcast %cst_49 : f32 to vector<16x19xf32>
    %126 = arith.addf %125, %124 : vector<16x19xf32>
    %127 = arith.divf %123, %126 : vector<16x19xf32>
    %c0_50 = arith.constant 0 : index
    %c0_51 = arith.constant 0 : index
    %128 = vector.load %arg15[%c0_50, %c0_51] : memref<19x64xf32, #tpu.memory_space<vmem>>, vector<19x64xf32>
    %cst_52 = arith.constant dense<0.000000e+00> : vector<16x64xf32>
    %129 = tpu.matmul %127, %128, %cst_52 {dimension_numbers = #tpu.dot_dimension_numbers<[1], [0], [0], [1], [0, 0, 1, 1], [], []>} : vector<16x19xf32>, vector<19x64xf32>, vector<16x64xf32> -> vector<16x64xf32>
    %c0_53 = arith.constant 0 : index
    %c0_54 = arith.constant 0 : index
    %130 = vector.load %arg16[%c0_53, %c0_54] : memref<1x64xf32, #tpu.memory_space<vmem>>, vector<1x64xf32>
    %131 = vector.broadcast %130 : vector<1x64xf32> to vector<16x64xf32>
    %132 = arith.addf %129, %131 : vector<16x64xf32>
    %133 = math.absf %132 : vector<16x64xf32>
    %cst_55 = arith.constant 1.000000e+00 : f32
    %134 = vector.broadcast %cst_55 : f32 to vector<16x64xf32>
    %135 = arith.addf %134, %133 : vector<16x64xf32>
    %136 = arith.divf %132, %135 : vector<16x64xf32>
    %cst_56 = arith.constant dense<0xFF800000> : vector<16xf32>
    %137 = vector.multi_reduction <maximumf>, %136, %cst_56 [1] : vector<16x64xf32> to vector<16xf32>
    %138 = vector.shape_cast %137 : vector<16xf32> to vector<16x1xf32>
    %139 = vector.broadcast %138 : vector<16x1xf32> to vector<16x64xf32>
    %140 = arith.subf %136, %139 : vector<16x64xf32>
    %141 = math.exp %140 : vector<16x64xf32>
    %cst_57 = arith.constant dense<0.000000e+00> : vector<16xf32>
    %142 = vector.multi_reduction <add>, %141, %cst_57 [1] : vector<16x64xf32> to vector<16xf32>
    %143 = vector.shape_cast %142 : vector<16xf32> to vector<16x1xf32>
    %144 = tpu.reciprocal %143 {approx = true} : vector<16x1xf32> -> vector<16x1xf32>
    %145 = vector.broadcast %144 : vector<16x1xf32> to vector<16x64xf32>
    %146 = arith.mulf %141, %145 : vector<16x64xf32>
    %c0_58 = arith.constant 0 : index
    %c0_59 = arith.constant 0 : index
    %147 = vector.load %arg17[%c0_58, %c0_59] : memref<19x64xf32, #tpu.memory_space<vmem>>, vector<19x64xf32>
    %cst_60 = arith.constant dense<0.000000e+00> : vector<16x64xf32>
    %148 = tpu.matmul %0, %147, %cst_60 {dimension_numbers = #tpu.dot_dimension_numbers<[1], [0], [0], [1], [0, 0, 1, 1], [], []>} : vector<16x19xf32>, vector<19x64xf32>, vector<16x64xf32> -> vector<16x64xf32>
    %c0_61 = arith.constant 0 : index
    %c0_62 = arith.constant 0 : index
    %149 = vector.load %arg18[%c0_61, %c0_62] : memref<1x64xf32, #tpu.memory_space<vmem>>, vector<1x64xf32>
    %150 = vector.broadcast %149 : vector<1x64xf32> to vector<16x64xf32>
    %151 = arith.addf %148, %150 : vector<16x64xf32>
    %152 = math.absf %151 : vector<16x64xf32>
    %cst_63 = arith.constant 1.000000e+00 : f32
    %153 = vector.broadcast %cst_63 : f32 to vector<16x64xf32>
    %154 = arith.addf %153, %152 : vector<16x64xf32>
    %155 = arith.divf %151, %154 : vector<16x64xf32>
    %156 = arith.mulf %146, %155 : vector<16x64xf32>
    %c0_64 = arith.constant 0 : index
    %c0_65 = arith.constant 0 : index
    %157 = vector.load %arg19[%c0_64, %c0_65] : memref<16x64xf32, #tpu.memory_space<vmem>>, vector<16x64xf32>
    tpu.vector_store %arg19[%c0_64, %c0_65], %156 {strides = array<i32>} : memref<16x64xf32, #tpu.memory_space<vmem>>, vector<16x64xf32>,
    return
  }
}

</mosaic_0001>

<bundles_post_ra>
// kernel: tpu_custom_call.1
= control target key start
LH: loop header
LB: loop body
LE: loop exit
PB: predicated region body
PF: predicated region fallthrough
CT: control target
= control target key end

     0   :  { %s2972_s0 = inlined_call_operand.hbm [shape: f32[16,19], index: 0, kind: input, shape index: {}]   ;;  %s2973_s1 = inlined_call_operand.hbm [shape: f32[32,1], index: 1, kind: input, shape index: {}]   ;;  %s2974_s2 = inlined_call_operand.hbm [shape: bf16[32,16], index: 2, kind: input, shape index: {}]   ;;  %s2975_s3 = inlined_call_operand.hbm [shape: bf16[16,32], index: 3, kind: input, shape index: {}]   ;;  %s2976_s4 = inlined_call_operand.hbm [shape: f32[1,9], index: 4, kind: input, shape index: {}]   ;;  %s2977_s5 = inlined_call_operand.hbm [shape: f32[1,9], index: 5, kind: input, shape index: {}]   ;;  %s2978_s6 = inlined_call_operand.hbm [shape: f32[9,19], index: 6, kind: input, shape index: {}]   ;;  %s2979_s7 = inlined_call_operand.hbm [shape: f32[1,19], index: 7, kind: input, shape index: {}]   ;;  %s2980_s8 = inlined_call_operand.hbm [shape: f32[2,19,95], index: 8, kind: input, shape index: {}]   ;;  %s2981_s9 = inlined_call_operand.hbm [shape: f32[19,57], index: 9, kind: input, shape index: {}]   ;;  %s2982_s10 = inlined_call_operand.hbm [shape: f32[1,57], index: 10, kind: input, shape index: {}]   ;;  %s2983_s11 = inlined_call_operand.hbm [shape: f32[1,57], index: 11, kind: input, shape index: {}]   ;;  %s2984_s12 = inlined_call_operand.hbm [shape: f32[1,19], index: 12, kind: input, shape index: {}]   ;;  %s2985_s13 = inlined_call_operand.hbm [shape: f32[38,19], index: 13, kind: input, shape index: {}]   ;;  %s2986_s14 = inlined_call_operand.hbm [shape: f32[1,19], index: 14, kind: input, shape index: {}]   ;;  %s2987_s15 = inlined_call_operand.hbm [shape: f32[19,64], index: 15, kind: input, shape index: {}]   ;;  %s2988_s16 = inlined_call_operand.hbm [shape: f32[1,64], index: 16, kind: input, shape index: {}]   ;;  %s2989_s17 = inlined_call_operand.hbm [shape: f32[19,64], index: 17, kind: input, shape index: {}]   ;;  %s2990_s18 = inlined_call_operand.hbm [shape: f32[1,64], index: 18, kind: input, shape index: {}]   ;;  %s2991_s19 = inlined_call_operand.hbm [shape: f32[16,64], index: 19, kind: output, shape index: {}]  }
   0x1   :  { %2999 = sst [smem:[#allocation44_spill]] %s2972_s0 }
   0x2   :  { %3000 = sst [smem:[#allocation45_spill]] %s2973_s1 }
   0x3   :  { %3001 = sst [smem:[#allocation46_spill]] %s2974_s2 }
   0x4   :  { %3002 = sst [smem:[#allocation47_spill]] %s2975_s3 }
   0x5   :  { %3003 = sst [smem:[#allocation48_spill]] %s2988_s16 }
   0x6   :  { %3004 = sst [smem:[#allocation49_spill]] %s2990_s18 }
   0x7   :  { %3005 = sst [smem:[#allocation50_spill]] %s2991_s19 }
   0x8   :  { %24 = vsyncpa [#allocation3], 0 }
   0x9   :  { %25 = vsyncpa [#allocation6], 0 }
   0xa   :  { %26 = vsyncpa [#allocation9], 0 }
   0xb   :  { %27 = vsyncpa [#allocation12], 0 }
   0xc   :  { %28 = vsyncpa [#allocation15], 0 }
   0xd   :  { %29 = vsyncpa [#allocation18], 0 }
   0xe   :  { %30 = vsyncpa [#allocation21], 0 }
   0xf   :  { %31 = vsyncpa [#allocation24], 0 }
  0x10   :  { %32 = vsyncpa [#allocation27], 0 }
  0x11   :  { %33 = vsyncpa [#allocation30], 0 }
  0x12   :  { %34 = vsyncpa [#allocation4], 0  ;;  %s2411_s0 = smov [#allocation5]   ;;  %s3006_s1 = sld [smem:[#allocation45_spill]] }
  0x13   :  { %s52_s30 = sshll.u32 %s2411_s0, 4  ;;  %s53_s30 = int_to_ptr.vmem [resolvable:$true] %s52_s30 }
  0x18   :  { %s1949_s22 = scalar_lea.hbm %s3006_s1, 512 }
  0x19   :  { %p1950_p0 = scmp.ne.s32.totalorder %s3006_s1, %s1949_s22  ;;  %p1953_p1 = scmp.lt.u32.totalorder %s1949_s22, %s3006_s1 }
  0x1b   :  { %p1955_p2 = pnand %p1953_p1, %p1950_p0 }
  0x1d   :  { %1958 = shalt.err (!%p1955_p2)
}
  0x1e   :  { %s1959_s3 = scalar_lea.vmem %s53_s30, 512  ;;  %p1964_p4 = scmp.lt.s32.totalorder %s53_s30, %s53_s30 }
  0x1f   :  { %p1960_p3 = scmp.ne.s32.totalorder %s53_s30, %s1959_s3  ;;  %p1965_p5 = scmp.lt.s32.totalorder %s1959_s3, %s1959_s3 }
  0x21   :  { %p1966_p6 = por %p1965_p5, %p1964_p4 }
  0x23   :  { %p1967_p7 = pnand %p1966_p6, %p1960_p3 }
  0x25   :  { %1970 = shalt.err (!%p1967_p7)
}
  0x26   :  { %s2412_s26 = smov 128   ;;  %s2413_s27 = smov 8  }
  0x27   :  { %58 = dma.hbm_to_vmem [thread:$0]  %s3006_s1, 512, %s53_s30, [#allocation6], %s2412_s26, %s2412_s26, %s2413_s27  }
  0x28   :  { %s2414_s0 = smov [#allocation8]   ;;  %s2415_s21 = smov [#allocation11]  }
  0x29   :  { %s76_s20 = sshll.u32 %s2414_s0, 4  ;;  %s99_s22 = sshll.u32 %s2415_s21, 4  ;;  %s77_s20 = int_to_ptr.vmem [resolvable:$true] %s76_s20  ;;  %s100_s22 = int_to_ptr.vmem [resolvable:$true] %s99_s22 }
  0x2a   :  { %s3007_s24 = sld [smem:[#allocation47_spill]] }
  0x30   :  { %s1971_s25 = scalar_lea.hbm %s3007_s24, 128 }
  0x31   :  { %p1972_p8 = scmp.ne.s32.totalorder %s3007_s24, %s1971_s25  ;;  %p1975_p9 = scmp.lt.u32.totalorder %s1971_s25, %s3007_s24 }
  0x33   :  { %p1977_p10 = pnand %p1975_p9, %p1972_p8 }
  0x35   :  { %1980 = shalt.err (!%p1977_p10)
}
  0x36   :  { %s1981_s30 = scalar_lea.vmem %s77_s20, 128  ;;  %p1986_p12 = scmp.lt.s32.totalorder %s77_s20, %s77_s20 }
  0x37   :  { %p1982_p11 = scmp.ne.s32.totalorder %s77_s20, %s1981_s30  ;;  %p1987_p13 = scmp.lt.s32.totalorder %s1981_s30, %s1981_s30 }
  0x39   :  { %p1988_p0 = por %p1987_p13, %p1986_p12 }
  0x3b   :  { %p1989_p1 = pnand %p1988_p0, %p1982_p11 }
  0x3d   :  { %1992 = shalt.err (!%p1989_p1)
}
  0x3e   :  { %s2416_s1 = smov 64   ;;  %s2417_s28 = smov 4  }
  0x3f   :  { %82 = dma.hbm_to_vmem [thread:$0]  %s3007_s24, 128, %s77_s20, [#allocation9], %s2416_s1, %s2416_s1, %s2417_s28  }
  0x40   :  { %s1993_s0 = scalar_lea.hbm %s2977_s5, 16 }
  0x41   :  { %p1994_p2 = scmp.ne.s32.totalorder %s2977_s5, %s1993_s0  ;;  %p1997_p3 = scmp.lt.u32.totalorder %s1993_s0, %s2977_s5 }
  0x43   :  { %p1999_p4 = pnand %p1997_p3, %p1994_p2 }
  0x45   :  { %2002 = shalt.err (!%p1999_p4)
}
  0x46   :  { %s2003_s3 = scalar_lea.vmem %s100_s22, 16  ;;  %s2007_s30 = scalar_lea.vmem %s100_s22, 32 }
  0x47   :  { %p2004_p5 = scmp.ne.s32.totalorder %s100_s22, %s2003_s3  ;;  %p2008_p6 = scmp.lt.s32.totalorder %s100_s22, %s100_s22 }
  0x48   :  { %p2009_p7 = scmp.lt.s32.totalorder %s2007_s30, %s2003_s3 }
  0x4a   :  { %p2010_p8 = por %p2009_p7, %p2008_p6 }
  0x4c   :  { %p2011_p9 = pnand %p2010_p8, %p2004_p5 }
  0x4e   :  { %2014 = shalt.err (!%p2011_p9)
}
  0x4f   :  { %102 = dma.hbm_to_vmem [thread:$0]  %s2977_s5, 16, %s100_s22, [#allocation12]  }
  0x50   :  { %s2418_s19 = smov [#allocation14]   ;;  %s2419_s16 = smov [#allocation17]  }
  0x51   :  { %s121_s29 = sshll.u32 %s2418_s19, 4  ;;  %s142_s18 = sshll.u32 %s2419_s16, 4  ;;  %s122_s29 = int_to_ptr.vmem [resolvable:$true] %s121_s29  ;;  %s143_s18 = int_to_ptr.vmem [resolvable:$true] %s142_s18 }
  0x52   :  { %s2015_s2 = scalar_lea.hbm %s2979_s7, 16 }
  0x53   :  { %p2016_p10 = scmp.ne.s32.totalorder %s2979_s7, %s2015_s2  ;;  %p2019_p11 = scmp.lt.u32.totalorder %s2015_s2, %s2979_s7 }
  0x55   :  { %p2021_p12 = pnand %p2019_p11, %p2016_p10 }
  0x57   :  { %2024 = shalt.err (!%p2021_p12)
}
  0x58   :  { %s2025_s5 = scalar_lea.vmem %s122_s29, 16  ;;  %s2029_s22 = scalar_lea.vmem %s122_s29, 32 }
  0x59   :  { %p2026_p13 = scmp.ne.s32.totalorder %s122_s29, %s2025_s5  ;;  %p2030_p0 = scmp.lt.s32.totalorder %s122_s29, %s122_s29 }
  0x5a   :  { %p2031_p1 = scmp.lt.s32.totalorder %s2029_s22, %s2025_s5 }
  0x5c   :  { %p2032_p2 = por %p2031_p1, %p2030_p0 }
  0x5e   :  { %p2033_p3 = pnand %p2032_p2, %p2026_p13 }
  0x60   :  { %2036 = shalt.err (!%p2033_p3)
}
  0x61   :  { %124 = dma.hbm_to_vmem [thread:$0]  %s2979_s7, 16, %s122_s29, [#allocation15]  }
  0x62   :  { %s2037_s0 = scalar_lea.hbm %s2981_s9, 384 }
  0x63   :  { %p2038_p4 = scmp.ne.s32.totalorder %s2981_s9, %s2037_s0  ;;  %p2041_p5 = scmp.lt.u32.totalorder %s2037_s0, %s2981_s9 }
  0x65   :  { %p2043_p6 = pnand %p2041_p5, %p2038_p4 }
  0x67   :  { %2046 = shalt.err (!%p2043_p6)
}
  0x68   :  { %s2047_s3 = scalar_lea.vmem %s143_s18, 384  ;;  %p2052_p8 = scmp.lt.s32.totalorder %s143_s18, %s143_s18 }
  0x69   :  { %p2048_p7 = scmp.ne.s32.totalorder %s143_s18, %s2047_s3  ;;  %p2053_p9 = scmp.lt.s32.totalorder %s2047_s3, %s2047_s3 }
  0x6b   :  { %p2054_p10 = por %p2053_p9, %p2052_p8 }
  0x6d   :  { %p2055_p11 = pnand %p2054_p10, %p2048_p7 }
  0x6f   :  { %2058 = shalt.err (!%p2055_p11)
}
  0x70   :  { %148 = dma.hbm_to_vmem [thread:$0]  %s2981_s9, 384, %s143_s18, [#allocation18], %s2412_s26, %s2412_s26, %s2413_s27  }
  0x71   :  { %s2420_s30 = smov [#allocation20]   ;;  %s2421_s22 = smov [#allocation23]  }
  0x72   :  { %s165_s5 = sshll.u32 %s2420_s30, 4  ;;  %s184_s20 = sshll.u32 %s2421_s22, 4  ;;  %s166_s5 = int_to_ptr.vmem [resolvable:$true] %s165_s5  ;;  %s185_s20 = int_to_ptr.vmem [resolvable:$true] %s184_s20 }
  0x73   :  { %s2059_s16 = scalar_lea.hbm %s2983_s11, 16 }
  0x74   :  { %p2060_p12 = scmp.ne.s32.totalorder %s2983_s11, %s2059_s16  ;;  %p2063_p13 = scmp.lt.u32.totalorder %s2059_s16, %s2983_s11 }
  0x76   :  { %p2065_p0 = pnand %p2063_p13, %p2060_p12 }
  0x78   :  { %2068 = shalt.err (!%p2065_p0)
}
  0x79   :  { %s2069_s9 = scalar_lea.vmem %s166_s5, 16  ;;  %s2073_s18 = scalar_lea.vmem %s166_s5, 32 }
  0x7a   :  { %p2070_p1 = scmp.ne.s32.totalorder %s166_s5, %s2069_s9  ;;  %p2074_p2 = scmp.lt.s32.totalorder %s166_s5, %s166_s5 }
  0x7b   :  { %p2075_p3 = scmp.lt.s32.totalorder %s2073_s18, %s2069_s9 }
  0x7d   :  { %p2076_p4 = por %p2075_p3, %p2074_p2 }
  0x7f   :  { %p2077_p5 = pnand %p2076_p4, %p2070_p1 }
  0x81   :  { %2080 = shalt.err (!%p2077_p5)
}
  0x82   :  { %168 = dma.hbm_to_vmem [thread:$0]  %s2983_s11, 16, %s166_s5, [#allocation21]  }
  0x83   :  { %s2081_s30 = scalar_lea.hbm %s2985_s13, 640 }
  0x84   :  { %p2082_p6 = scmp.ne.s32.totalorder %s2985_s13, %s2081_s30  ;;  %p2085_p7 = scmp.lt.u32.totalorder %s2081_s30, %s2985_s13 }
  0x86   :  { %p2087_p8 = pnand %p2085_p7, %p2082_p6 }
  0x88   :  { %2090 = shalt.err (!%p2087_p8)
}
  0x89   :  { %s2091_s0 = scalar_lea.vmem %s185_s20, 640  ;;  %p2096_p10 = scmp.lt.s32.totalorder %s185_s20, %s185_s20 }
  0x8a   :  { %p2092_p9 = scmp.ne.s32.totalorder %s185_s20, %s2091_s0  ;;  %p2097_p11 = scmp.lt.s32.totalorder %s2091_s0, %s2091_s0 }
  0x8c   :  { %p2098_p12 = por %p2097_p11, %p2096_p10 }
  0x8e   :  { %p2099_p13 = pnand %p2098_p12, %p2092_p9 }
  0x90   :  { %2102 = shalt.err (!%p2099_p13)
}
  0x91   :  { %190 = dma.hbm_to_vmem [thread:$0]  %s2985_s13, 640, %s185_s20, [#allocation24], %s2412_s26, %s2412_s26, %s2413_s27  }
  0x92   :  { %s2422_s21 = smov [#allocation26]   ;;  %s2423_s23 = smov [#allocation29]  }
  0x93   :  { %s206_s2 = sshll.u32 %s2422_s21, 4  ;;  %s228_s9 = sshll.u32 %s2423_s23, 4  ;;  %s207_s2 = int_to_ptr.vmem [resolvable:$true] %s206_s2  ;;  %s229_s9 = int_to_ptr.vmem [resolvable:$true] %s228_s9 }
  0x94   :  { %s2103_s3 = scalar_lea.hbm %s2987_s15, 384 }
  0x95   :  { %p2104_p0 = scmp.ne.s32.totalorder %s2987_s15, %s2103_s3  ;;  %p2107_p1 = scmp.lt.u32.totalorder %s2103_s3, %s2987_s15 }
  0x97   :  { %p2109_p2 = pnand %p2107_p1, %p2104_p0 }
  0x99   :  { %2112 = shalt.err (!%p2109_p2)
}
  0x9a   :  { %s2113_s13 = scalar_lea.vmem %s207_s2, 384  ;;  %p2118_p4 = scmp.lt.s32.totalorder %s207_s2, %s207_s2 }
  0x9b   :  { %p2114_p3 = scmp.ne.s32.totalorder %s207_s2, %s2113_s13  ;;  %p2119_p5 = scmp.lt.s32.totalorder %s2113_s13, %s2113_s13 }
  0x9d   :  { %p2120_p6 = por %p2119_p5, %p2118_p4 }
  0x9f   :  { %p2121_p7 = pnand %p2120_p6, %p2114_p3 }
  0xa1   :  { %2124 = shalt.err (!%p2121_p7)
}
  0xa2   :  { %212 = dma.hbm_to_vmem [thread:$0]  %s2987_s15, 384, %s207_s2, [#allocation27], %s2412_s26, %s2412_s26, %s2413_s27  }
  0xa3   :  { %s2125_s0 = scalar_lea.hbm %s2989_s17, 384 }
  0xa4   :  { %p2126_p8 = scmp.ne.s32.totalorder %s2989_s17, %s2125_s0  ;;  %p2129_p9 = scmp.lt.u32.totalorder %s2125_s0, %s2989_s17 }
  0xa6   :  { %p2131_p10 = pnand %p2129_p9, %p2126_p8 }
  0xa8   :  { %2134 = shalt.err (!%p2131_p10)
}
  0xa9   :  { %s2135_s18 = scalar_lea.vmem %s229_s9, 384  ;;  %p2140_p12 = scmp.lt.s32.totalorder %s229_s9, %s229_s9 }
  0xaa   :  { %p2136_p11 = scmp.ne.s32.totalorder %s229_s9, %s2135_s18  ;;  %p2141_p13 = scmp.lt.s32.totalorder %s2135_s18, %s2135_s18 }
  0xac   :  { %p2142_p0 = por %p2141_p13, %p2140_p12 }
  0xae   :  { %p2143_p1 = pnand %p2142_p0, %p2136_p11 }
  0xb0   :  { %2146 = shalt.err (!%p2143_p1)
}
  0xb1   :  { %234 = dma.hbm_to_vmem [thread:$0]  %s2989_s17, 384, %s229_s9, [#allocation30], %s2412_s26, %s2412_s26, %s2413_s27  }
  0xb2   :  { %s2424_s25 = smov [#allocation2]   ;;  %s2425_s7 = smov [#allocation7]  }
  0xb3   :  { %s40_s3 = sshll.u32 %s2424_s25, 4  ;;  %s64_s29 = sshll.u32 %s2425_s7, 4  ;;  %s41_s3 = int_to_ptr.vmem [resolvable:$true] %s40_s3  ;;  %s65_s29 = int_to_ptr.vmem [resolvable:$true] %s64_s29 }
  0xb4   :  { %s3008_s13 = sld [smem:[#allocation44_spill]] }
  0xba   :  { %s2147_s20 = scalar_lea.hbm %s3008_s13, 256 }
  0xbb   :  { %p2148_p2 = scmp.ne.s32.totalorder %s3008_s13, %s2147_s20  ;;  %p2151_p3 = scmp.lt.u32.totalorder %s2147_s20, %s3008_s13 }
  0xbd   :  { %p2153_p4 = pnand %p2151_p3, %p2148_p2 }
  0xbf   :  { %2156 = shalt.err (!%p2153_p4)
}
  0xc0   :  { %s2157_s17 = scalar_lea.vmem %s41_s3, 256  ;;  %p2162_p6 = scmp.lt.s32.totalorder %s41_s3, %s41_s3 }
  0xc1   :  { %p2158_p5 = scmp.ne.s32.totalorder %s41_s3, %s2157_s17  ;;  %p2163_p7 = scmp.lt.s32.totalorder %s2157_s17, %s2157_s17 }
  0xc3   :  { %p2164_p8 = por %p2163_p7, %p2162_p6 }
  0xc5   :  { %p2165_p9 = pnand %p2164_p8, %p2158_p5 }
  0xc7   :  { %2168 = shalt.err (!%p2165_p9)
}
  0xc8   :  { %46 = dma.hbm_to_vmem [thread:$0]  %s3008_s13, 256, %s41_s3, [#allocation3], %s2412_s26, %s2412_s26, %s2413_s27  }
  0xc9   :  { %s3009_s23 = sld [smem:[#allocation46_spill]] }
  0xcf   :  { %s2169_s18 = scalar_lea.hbm %s3009_s23, 256 }
  0xd0   :  { %p2170_p10 = scmp.ne.s32.totalorder %s3009_s23, %s2169_s18  ;;  %p2173_p11 = scmp.lt.u32.totalorder %s2169_s18, %s3009_s23 }
  0xd2   :  { %p2175_p12 = pnand %p2173_p11, %p2170_p10 }
  0xd4   :  { %2178 = shalt.err (!%p2175_p12)
}
  0xd5   :  { %s2179_s30 = scalar_lea.vmem %s65_s29, 256  ;;  %p2184_p0 = scmp.lt.s32.totalorder %s65_s29, %s65_s29 }
  0xd6   :  { %p2180_p13 = scmp.ne.s32.totalorder %s65_s29, %s2179_s30  ;;  %p2185_p1 = scmp.lt.s32.totalorder %s2179_s30, %s2179_s30 }
  0xd8   :  { %p2186_p2 = por %p2185_p1, %p2184_p0 }
  0xda   :  { %p2187_p3 = pnand %p2186_p2, %p2180_p13 }
  0xdc   :  { %2190 = shalt.err (!%p2187_p3)
}
  0xdd   :  { %70 = dma.hbm_to_vmem [thread:$0]  %s3009_s23, 256, %s65_s29, [#allocation6], %s2416_s1, %s2416_s1, %s2417_s28  }
  0xde   :  { %s2426_s13 = smov [#allocation10]   ;;  %s2427_s24 = smov [#allocation13]  }
  0xdf   :  { %s89_s20 = sshll.u32 %s2426_s13, 4  ;;  %s108_s19 = sshll.u32 %s2427_s24, 4  ;;  %s90_s20 = int_to_ptr.vmem [resolvable:$true] %s89_s20  ;;  %s109_s19 = int_to_ptr.vmem [resolvable:$true] %s108_s19 }
  0xe0   :  { %s2191_s17 = scalar_lea.hbm %s2976_s4, 16 }
  0xe1   :  { %p2192_p4 = scmp.ne.s32.totalorder %s2976_s4, %s2191_s17  ;;  %p2195_p5 = scmp.lt.u32.totalorder %s2191_s17, %s2976_s4 }
  0xe3   :  { %p2197_p6 = pnand %p2195_p5, %p2192_p4 }
  0xe5   :  { %2200 = shalt.err (!%p2197_p6)
}
  0xe6   :  { %s2201_s1 = scalar_lea.vmem %s90_s20, 16  ;;  %s2205_s28 = scalar_lea.vmem %s90_s20, 32 }
  0xe7   :  { %p2202_p7 = scmp.ne.s32.totalorder %s90_s20, %s2201_s1  ;;  %p2206_p8 = scmp.lt.s32.totalorder %s90_s20, %s90_s20 }
  0xe8   :  { %p2207_p9 = scmp.lt.s32.totalorder %s2205_s28, %s2201_s1 }
  0xea   :  { %p2208_p10 = por %p2207_p9, %p2206_p8 }
  0xec   :  { %p2209_p11 = pnand %p2208_p10, %p2202_p7 }
  0xee   :  { %2212 = shalt.err (!%p2209_p11)
}
  0xef   :  { %92 = dma.hbm_to_vmem [thread:$0]  %s2976_s4, 16, %s90_s20, [#allocation9]  }
  0xf0   :  { %s2213_s2 = scalar_lea.hbm %s2978_s6, 256 }
  0xf1   :  { %p2214_p12 = scmp.ne.s32.totalorder %s2978_s6, %s2213_s2  ;;  %p2217_p13 = scmp.lt.u32.totalorder %s2213_s2, %s2978_s6 }
  0xf3   :  { %p2219_p0 = pnand %p2217_p13, %p2214_p12 }
  0xf5   :  { %2222 = shalt.err (!%p2219_p0)
}
  0xf6   :  { %s2223_s22 = scalar_lea.vmem %s109_s19, 256  ;;  %p2228_p2 = scmp.lt.s32.totalorder %s109_s19, %s109_s19 }
  0xf7   :  { %p2224_p1 = scmp.ne.s32.totalorder %s109_s19, %s2223_s22  ;;  %p2229_p3 = scmp.lt.s32.totalorder %s2223_s22, %s2223_s22 }
  0xf9   :  { %p2230_p4 = por %p2229_p3, %p2228_p2 }
  0xfb   :  { %p2231_p5 = pnand %p2230_p4, %p2224_p1 }
  0xfd   :  { %2234 = shalt.err (!%p2231_p5)
}
  0xfe   :  { %114 = dma.hbm_to_vmem [thread:$0]  %s2978_s6, 256, %s109_s19, [#allocation12], %s2412_s26, %s2412_s26, %s2413_s27  }
  0xff   :  { %s2428_s20 = smov [#allocation16]   ;;  %s2429_s16 = smov [#allocation19]  }
 0x100   :  { %s130_s24 = sshll.u32 %s2428_s20, 4  ;;  %s155_s0 = sshll.u32 %s2429_s16, 4  ;;  %s131_s24 = int_to_ptr.vmem [resolvable:$true] %s130_s24  ;;  %s156_s0 = int_to_ptr.vmem [resolvable:$true] %s155_s0 }
 0x101   :  { %s2235_s11 = scalar_lea.hbm %s2980_s8, 768 }
 0x102   :  { %p2236_p6 = scmp.ne.s32.totalorder %s2980_s8, %s2235_s11  ;;  %p2239_p7 = scmp.lt.u32.totalorder %s2235_s11, %s2980_s8 }
 0x104   :  { %p2241_p8 = pnand %p2239_p7, %p2236_p6 }
 0x106   :  { %2244 = shalt.err (!%p2241_p8)
}
 0x107   :  { %s2245_s6 = scalar_lea.vmem %s131_s24, 768  ;;  %p2250_p10 = scmp.lt.s32.totalorder %s131_s24, %s131_s24 }
 0x108   :  { %p2246_p9 = scmp.ne.s32.totalorder %s131_s24, %s2245_s6  ;;  %p2251_p11 = scmp.lt.s32.totalorder %s2245_s6, %s2245_s6 }
 0x10a   :  { %p2252_p12 = por %p2251_p11, %p2250_p10 }
 0x10c   :  { %p2253_p13 = pnand %p2252_p12, %p2246_p9 }
 0x10e   :  { %2256 = shalt.err (!%p2253_p13)
}
 0x10f   :  { %136 = dma.hbm_to_vmem [thread:$0]  %s2980_s8, 768, %s131_s24, [#allocation15], %s2412_s26, %s2412_s26, %s2413_s27  }
 0x110   :  { %s2257_s15 = scalar_lea.hbm %s2982_s10, 16 }
 0x111   :  { %p2258_p0 = scmp.ne.s32.totalorder %s2982_s10, %s2257_s15  ;;  %p2261_p1 = scmp.lt.u32.totalorder %s2257_s15, %s2982_s10 }
 0x113   :  { %p2263_p2 = pnand %p2261_p1, %p2258_p0 }
 0x115   :  { %2266 = shalt.err (!%p2263_p2)
}
 0x116   :  { %s2267_s3 = scalar_lea.vmem %s156_s0, 16  ;;  %s2271_s22 = scalar_lea.vmem %s156_s0, 32 }
 0x117   :  { %p2268_p3 = scmp.ne.s32.totalorder %s156_s0, %s2267_s3  ;;  %p2272_p4 = scmp.lt.s32.totalorder %s156_s0, %s156_s0 }
 0x118   :  { %p2273_p5 = scmp.lt.s32.totalorder %s2271_s22, %s2267_s3 }
 0x11a   :  { %p2274_p6 = por %p2273_p5, %p2272_p4 }
 0x11c   :  { %p2275_p7 = pnand %p2274_p6, %p2268_p3 }
 0x11e   :  { %2278 = shalt.err (!%p2275_p7)
}
 0x11f   :  { %158 = dma.hbm_to_vmem [thread:$0]  %s2982_s10, 16, %s156_s0, [#allocation18]  }
 0x120   :  { %s2430_s13 = smov [#allocation22]   ;;  %s2431_s24 = smov [#allocation25]  }
 0x121   :  { %s175_s20 = sshll.u32 %s2430_s13, 4  ;;  %s197_s16 = sshll.u32 %s2431_s24, 4  ;;  %s176_s20 = int_to_ptr.vmem [resolvable:$true] %s175_s20  ;;  %s198_s16 = int_to_ptr.vmem [resolvable:$true] %s197_s16 }
 0x122   :  { %s2279_s11 = scalar_lea.hbm %s2984_s12, 16 }
 0x123   :  { %p2280_p8 = scmp.ne.s32.totalorder %s2984_s12, %s2279_s11  ;;  %p2283_p9 = scmp.lt.u32.totalorder %s2279_s11, %s2984_s12 }
 0x125   :  { %p2285_p10 = pnand %p2283_p9, %p2280_p8 }
 0x127   :  { %2288 = shalt.err (!%p2285_p10)
}
 0x128   :  { %s2289_s10 = scalar_lea.vmem %s176_s20, 16  ;;  %s2293_s0 = scalar_lea.vmem %s176_s20, 32 }
 0x129   :  { %p2290_p11 = scmp.ne.s32.totalorder %s176_s20, %s2289_s10  ;;  %p2294_p12 = scmp.lt.s32.totalorder %s176_s20, %s176_s20 }
 0x12a   :  { %p2295_p13 = scmp.lt.s32.totalorder %s2293_s0, %s2289_s10 }
 0x12c   :  { %p2296_p0 = por %p2295_p13, %p2294_p12 }
 0x12e   :  { %p2297_p1 = pnand %p2296_p0, %p2290_p11 }
 0x130   :  { %2300 = shalt.err (!%p2297_p1)
}
 0x131   :  { %178 = dma.hbm_to_vmem [thread:$0]  %s2984_s12, 16, %s176_s20, [#allocation21]  }
 0x132   :  { %s2301_s18 = scalar_lea.hbm %s2986_s14, 16 }
 0x133   :  { %p2302_p2 = scmp.ne.s32.totalorder %s2986_s14, %s2301_s18  ;;  %p2305_p3 = scmp.lt.u32.totalorder %s2301_s18, %s2986_s14 }
 0x135   :  { %p2307_p4 = pnand %p2305_p3, %p2302_p2 }
 0x137   :  { %2310 = shalt.err (!%p2307_p4)
}
 0x138   :  { %s2311_s30 = scalar_lea.vmem %s198_s16, 16  ;;  %s2315_s3 = scalar_lea.vmem %s198_s16, 32 }
 0x139   :  { %p2312_p5 = scmp.ne.s32.totalorder %s198_s16, %s2311_s30  ;;  %p2316_p6 = scmp.lt.s32.totalorder %s198_s16, %s198_s16 }
 0x13a   :  { %p2317_p7 = scmp.lt.s32.totalorder %s2315_s3, %s2311_s30 }
 0x13c   :  { %p2318_p8 = por %p2317_p7, %p2316_p6 }
 0x13e   :  { %p2319_p9 = pnand %p2318_p8, %p2312_p5 }
 0x140   :  { %2322 = shalt.err (!%p2319_p9)
}
 0x141   :  { %200 = dma.hbm_to_vmem [thread:$0]  %s2986_s14, 16, %s198_s16, [#allocation24]  }
 0x142   :  { %s2432_s8 = smov [#allocation28]   ;;  %s2433_s13 = smov [#allocation31]  }
 0x143   :  { %s219_s4 = sshll.u32 %s2432_s8, 4  ;;  %s241_s20 = sshll.u32 %s2433_s13, 4  ;;  %s220_s4 = int_to_ptr.vmem [resolvable:$true] %s219_s4  ;;  %s242_s20 = int_to_ptr.vmem [resolvable:$true] %s241_s20 }
 0x144   :  { %s3010_s9 = sld [smem:[#allocation48_spill]] }
 0x14a   :  { %s2323_s11 = scalar_lea.hbm %s3010_s9, 16 }
 0x14b   :  { %p2324_p10 = scmp.ne.s32.totalorder %s3010_s9, %s2323_s11  ;;  %p2327_p11 = scmp.lt.u32.totalorder %s2323_s11, %s3010_s9 }
 0x14d   :  { %p2329_p12 = pnand %p2327_p11, %p2324_p10 }
 0x14f   :  { %2332 = shalt.err (!%p2329_p12)
}
 0x150   :  { %s2333_s14 = scalar_lea.vmem %s220_s4, 16  ;;  %s2337_s16 = scalar_lea.vmem %s220_s4, 32 }
 0x151   :  { %p2334_p13 = scmp.ne.s32.totalorder %s220_s4, %s2333_s14  ;;  %p2338_p0 = scmp.lt.s32.totalorder %s220_s4, %s220_s4 }
 0x152   :  { %p2339_p1 = scmp.lt.s32.totalorder %s2337_s16, %s2333_s14 }
 0x154   :  { %p2340_p2 = por %p2339_p1, %p2338_p0 }
 0x156   :  { %p2341_p3 = pnand %p2340_p2, %p2334_p13 }
 0x158   :  { %2344 = shalt.err (!%p2341_p3)
}
 0x159   :  { %222 = dma.hbm_to_vmem [thread:$0]  %s3010_s9, 16, %s220_s4, [#allocation27]  }
 0x15a   :  { %s3011_s29 = sld [smem:[#allocation49_spill]] }
 0x160   :  { %s2345_s23 = scalar_lea.hbm %s3011_s29, 16 }
 0x161   :  { %p2346_p4 = scmp.ne.s32.totalorder %s3011_s29, %s2345_s23  ;;  %p2349_p5 = scmp.lt.u32.totalorder %s2345_s23, %s3011_s29 }
 0x163   :  { %p2351_p6 = pnand %p2349_p5, %p2346_p4 }
 0x165   :  { %2354 = shalt.err (!%p2351_p6)
}
 0x166   :  { %s2355_s7 = scalar_lea.vmem %s242_s20, 16  ;;  %s2359_s30 = scalar_lea.vmem %s242_s20, 32 }
 0x167   :  { %p2356_p7 = scmp.ne.s32.totalorder %s242_s20, %s2355_s7  ;;  %p2360_p8 = scmp.lt.s32.totalorder %s242_s20, %s242_s20 }
 0x168   :  { %p2361_p9 = scmp.lt.s32.totalorder %s2359_s30, %s2355_s7 }
 0x16a   :  { %p2362_p10 = por %p2361_p9, %p2360_p8 }
 0x16c   :  { %p2363_p11 = pnand %p2362_p10, %p2356_p7 }
 0x16e   :  { %2366 = shalt.err (!%p2363_p11)
}
 0x16f   :  { %244 = dma.hbm_to_vmem [thread:$0]  %s3011_s29, 16, %s242_s20, [#allocation30]  }
 0x170   :  { %2389 = dma.done.wait [#allocation3], 256  }
 0x171   :  { %2390 = vsyncadd [#allocation3], 4294967040 }
 0x172   :  { %2391 = dma.done.wait [#allocation6], 768  }
 0x173   :  { %2392 = vsyncadd [#allocation6], 4294966528 }
 0x174   :  { %2393 = dma.done.wait [#allocation9], 144  }
 0x175   :  { %2394 = vsyncadd [#allocation9], 4294967152 }
 0x176   :  { %2395 = dma.done.wait [#allocation12], 272  }
 0x177   :  { %2396 = vsyncadd [#allocation12], 4294967024 }
 0x178   :  { %2397 = dma.done.wait [#allocation15], 784  }
 0x179   :  { %2398 = vsyncadd [#allocation15], 4294966512 }
 0x17a   :  { %2399 = dma.done.wait [#allocation18], 400  }
 0x17b   :  { %2400 = vsyncadd [#allocation18], 4294966896 }
 0x17c   :  { %2401 = dma.done.wait [#allocation21], 32  }
 0x17d   :  { %2402 = vsyncadd [#allocation21], 4294967264 }
 0x17e   :  { %2403 = dma.done.wait [#allocation24], 656  }
 0x17f   :  { %2404 = vsyncadd [#allocation24], 4294966640 }
 0x180   :  { %2405 = dma.done.wait [#allocation27], 400  }
 0x181   :  { %2406 = vsyncadd [#allocation27], 4294966896 }
 0x182   :  { %2407 = dma.done.wait [#allocation30], 400  }
 0x183   :  { %2408 = vsyncadd [#allocation30], 4294966896  ;;  %v2434_v0 = vmov 0   ;;  %vm509_vm0 = vcmask 154624   ;;  %v506_v1 = vld [vmem:[#allocation16] sm:$0xff]  ;;  %v507_v2 = vld [vmem:[#allocation16 + $0x8] sm:$0xff] }
 0x184   :  { %1884 = vset.pattern.permute.xlu0 %v2434_v0  ;;  %1885 = vset.pattern.permute.xlu1 %v2434_v0  ;;  %v1819_v3 = vpack.c.bf16 %v507_v2, %v506_v1  ;;  %v2802_v4 = vld [vmem:[#allocation2] sm:$0xff]  ;;  %v305_v5 = vld [vmem:[#allocation5] sm:$0xff]  ;;  %vm516_vm1 = vcmask 1042432   ;;  %v306_v8 = vld [vmem:[#allocation5 + $0x8] sm:$0xff]  ;;  %vm389_vm2 = vcmask 1040384   ;;  %vm2435_vm3 = vmmov 1  }
 0x185   :  { %v508_v6 = vld [vmem:[#allocation16 + $0x10] sm:$0x7]  ;;  %1724 = vmatprep.mubr.msk.f32.mxu1 %vm509_vm0, %v2802_v4  ;;  %312 = vperm.xlu0 %1884, %v305_v5   ;;  %v307_v7 = vld [vmem:[#allocation5 + $0x10] sm:$0xff]  ;;  %v368_v12 = vld [vmem:[#allocation13 + $0x8] sm:$0x1]  ;;  %vm616_vm5 = vcmask 130048  }
 0x186   :  { %1820 = vmatprep.subr.bf16.mxu1 %v1819_v3  ;;  %322 = vperm.xlu1 %1885, %v307_v7   ;;  %v308_v9 = vld [vmem:[#allocation5 + $0x18] sm:$0xff]  ;;  %vm1814_vm4 = vmpackc.low %vm389_vm2, %vm2435_vm3  ;;  %v2812_v14 = vld [vmem:[#allocation7] sm:$0xff]   ;;  %vm376_vm6 = vcmask 72704   ;;  %s2436_s22 = smov 109   ;;  %s2437_s8 = smov 38   ;;  %v2438_v50 = vmov 0.0  }
 0x187   :  { %1822 = vmatpush3.bf16.msra.mxu1 %v1819_v3  ;;  %v2807_v10 = vld [vmem:[#allocation2 + $0x8] sm:$0xff]  ;;  %v2818_v49 = vld [vmem:[#allocation7 + $0x8] sm:$0xff]   ;;  %vm2439_vm7 = vmmov 0   ;;  %s2440_s4 = smov 90   ;;  %s2441_s13 = smov 52   ;;  %vm691_vm8 = vcmask 261120  }
 0x188   :  { %1722 = vmatprep.subr.msk.mxu1 %vm516_vm1, %v508_v6  ;;  %v367_v11 = vld [vmem:[#allocation13] sm:$0xff]  ;;  %v1605_v15 = vld [vmem:[#allocation10] ss:$0 sm:$0xff]  ;;  %v1606_v16 = vld [vmem:[#allocation11] ss:$0 sm:$0xff]  ;;  %s2442_s20 = smov 19  }
 0x189   :  { %317 = vperm.xlu0 %1884, %v306_v8   ;;  %v1813_v13 = vpack.c.bf16 %v368_v12, %v367_v11  ;;  %v1616_v48 = vld [vmem:[#allocation20] ss:$0 sm:$0xff]  ;;  %v503_v51 = vld [vmem:[#allocation17] sm:$0xff]  ;;  %v504_v52 = vld [vmem:[#allocation17 + $0x8] sm:$0xff]  ;;  %vm1267_vm9 = vcmask 1045504   ;;  %vm1260_vm10 = vcmask 310272  }
 0x18a   :  { %327 = vperm.xlu1 %1885, %v308_v9   ;;  %v2826_v53 = vpack.c.bf16 %v504_v52, %v503_v51  ;;  %v1607_v62 = vld [vmem:[#allocation14] ss:$0 sm:$0xff]  ;;  %vm1456_vm11 = vcmask 523264   ;;  %s2443_s24 = smov [#allocation32]  }
 0x18b   :  { %1723 = vmatpush3.msk.msra.mxu1 %vm516_vm1, %v508_v6  ;;  %1815 = vmatprep.subr.msk.bf16.mxu0 %vm1814_vm4, %v1813_v13  ;;  %s1584_s17 = sshll.u32 %s2443_s24, 4  ;;  %s1585_s17 = int_to_ptr.vmem [resolvable:$true] %s1584_s17 }
 0x18c   :  { %1725 = vmatmul.mubr.msk.f32.vlgmr.msra.gmra.mrb[0].mxu1 %vm509_vm0, %v2807_v10  ;;  %1818 = vmatpush3.bf16.msk.msra.mxu0 %vm1814_vm4, %v1813_v13  ;;  %s2367_s9 = scalar_lea.vmem %s1585_s17, 256  ;;  %p2372_p13 = scmp.lt.s32.totalorder %s1585_s17, %s1585_s17 }
 0x18d   :  { %1729 = vmatprep.mubr.msk.bf16.mxu1 %vm616_vm5, %v2812_v14  ;;  %1733 = vmatprep.subr.bf16.mxu0 %v2438_v50  ;;  %p2368_p12 = scmp.ne.s32.totalorder %s1585_s17, %s2367_s9  ;;  %p2373_p0 = scmp.lt.s32.totalorder %s2367_s9, %s2367_s9 }
 0x18f   :  { %p2374_p1 = por %p2373_p0, %p2372_p13 }
 0x191   :  { %p2375_p2 = pnand %p2374_p1, %p2368_p12 }
 0x204   :  { %v313_v17 = vpop.permute.xlu0 %312 }
 0x205   :  { %v336_v18 = vmul.f32 %v1605_v15, %v313_v17  ;;  %v323_v19 = vpop.permute.xlu1 %322 }
 0x206   :  { %v338_v20 = vmul.f32 %v1605_v15, %v323_v19 }
 0x207   :  { %v347_v21 = vadd.f32 %v1606_v16, %v336_v18 }
 0x208   :  { %v349_v22 = vadd.f32 %v1606_v16, %v338_v20  ;;  %v318_v23 = vpop.permute.xlu0 %317 }
 0x209   :  { %v351_v24 = vand.u32 2147483647, %v347_v21  ;;  %v337_v25 = vmul.f32 %v1605_v15, %v318_v23  ;;  %v328_v26 = vpop.permute.xlu1 %327 }
 0x20a   :  { %v353_v27 = vand.u32 2147483647, %v349_v22  ;;  %v339_v28 = vmul.f32 %v1605_v15, %v328_v26 }
 0x20b   :  { %v355_v29 = vadd.f32 1.0, %v351_v24  ;;  %v348_v30 = vadd.f32 %v1606_v16, %v337_v25 }
 0x20c   :  { %v357_v31 = vadd.f32 1.0, %v353_v27  ;;  %v350_v32 = vadd.f32 %v1606_v16, %v339_v28 }
 0x20d   :  { %1889 = vrcp.f32 %v355_v29  ;;  %v352_v33 = vand.u32 2147483647, %v348_v30 }
 0x20e   :  { %1891 = vrcp.f32 %v357_v31  ;;  %v354_v34 = vand.u32 2147483647, %v350_v32 }
 0x20f   :  { %v356_v35 = vadd.f32 1.0, %v352_v33  ;;  %v2855_v33 = vld [vmem:[#allocation17 + $0x10] sm:$0x7] }
 0x210   :  { %v358_v36 = vadd.f32 1.0, %v354_v34  ;;  %v2861_v34 = vld [vmem:[#allocation22] ss:$0 sm:$0xff] }
 0x211   :  { %1893 = vrcp.f32 %v356_v35 }
 0x212   :  { %1895 = vrcp.f32 %v358_v36 }
 0x217   :  { %v1890_v37 = vpop.eup %1889 }
 0x218   :  { %v1892_v38 = vpop.eup %1891  ;;  %v360_v39 = vmul.f32 %v1890_v37, %v347_v21 }
 0x219   :  { %v364_v41 = vmul.f32 %v1892_v38, %v349_v22 }
 0x21a   :  { %1712 = vmatprep.mubr.msk.f32.mxu0 %vm376_vm6, %v360_v39 }
 0x21b   :  { %v1894_v40 = vpop.eup %1893 }
 0x21c   :  { %v1896_v42 = vpop.eup %1895  ;;  %v362_v43 = vmul.f32 %v1894_v40, %v348_v30 }
 0x21d   :  { %v366_v44 = vmul.f32 %v1896_v42, %v350_v32  ;;  %v2851_v32 = vld [vmem:[#allocation8] sm:$0xff]  }
 0x21e   :  { %1713 = vmatmul.mubr.msk.f32.vlgmr.msra.gmra.mrb[0].mxu0 %vm376_vm6, %v362_v43 }
 0x21f   :  { %1715 = vmatprep.mubr.msk.f32.mxu0 %vm376_vm6, %v364_v41 }
 0x222   :  { %1716 = vmatmul.mubr.msk.f32.gmra.mrb[2].mxu0 %vm376_vm6, %v366_v44  ;;  %v2869_v44 = vld [vmem:[#allocation19] ss:$0 sm:$0xff] }
 0x223   :  { %1737 = vmatprep.mubr.msk.bf16.mxu0 %vm2439_vm7, %v2438_v50 }
 0x25f   :  { %v1726_v45 = vpop.f32.mrb[0].mxu1 }
 0x260   :  { %687 = vrot.lane.b32.xlu1 %v1726_v45, %s2436_s22  ;;  %v586_v46 = vpop.f32.mrb[1].mxu1 }
 0x261   :  { %v605_v47 = vpack.c.bf16 %v1726_v45, %v586_v46  ;;  %685 = vrot.lane.b32.xlu0 %v586_v46, %s2436_s22 }
 0x263   :  { %1727 = vmatprep.subr.bf16.mxu1 %v605_v47 }
 0x264   :  { %1728 = vmatpush3.bf16.msra.mxu1 %v605_v47 }
 0x265   :  { %600 = vrot.lane.b32.xlu0 %v1616_v48, %s2437_s8  ;;  %1824 = vmatprep.subr.bf16.mxu1 %v2826_v53 }
 0x267   :  { %1730 = vmatmul.mubr.msk.bf16.vlgmr.msra.gmra.mrb[4].mxu1 %vm616_vm5, %v2818_v49 }
 0x268   :  { %1826 = vmatpush3.bf16.msra.mxu1 %v2826_v53 }
 0x269   :  { %1745 = vmatprep.subr.msk.mxu1 %vm516_vm1, %v2855_v33 }
 0x26c   :  { %1746 = vmatpush3.msk.msra.mxu1 %vm516_vm1, %v2855_v33 }
 0x2d2   :  { %v688_v38 = vpop.permute.xlu1 %687 }
 0x2d3   :  { %v686_v54 = vpop.permute.xlu0 %685 }
 0x2d7   :  { %v2830_v55 = vpop.permute.xlu0 %600 }
 0x2d8   :  { %v604_v56 = vadd.f32 %v1726_v45, %v2830_v55  ;;  %v603_v57 = vadd.f32 %v2830_v55, %v586_v46 }
 0x2da   :  { %838 = vrot.lane.b32.xlu0 %v604_v56, %s2440_s4  ;;  %836 = vrot.lane.b32.xlu1 %v603_v57, %s2440_s4 }
 0x2de   :  { %858 = vrot.lane.b32.xlu0 %v604_v56, %s2441_s13  ;;  %856 = vrot.lane.b32.xlu1 %v603_v57, %s2441_s13 }
 0x2f1   :  { %v1714_v58 = vpop.f32.mrb[0].mxu0 }
 0x2f2   :  { %v459_v59 = vpop.f32.mrb[1].mxu0  ;;  %v465_v63 = vadd.f32 %v1714_v58, %v1607_v62 }
 0x2f3   :  { %v460_v2 = vadd.f32 %v1607_v62, %v459_v59 }
 0x2f4   :  { %v479_v3 = vand.u32 2147483647, %v465_v63 }
 0x2f5   :  { %v1717_v60 = vpop.f32.mrb[2].mxu0  ;;  %v478_v7 = vand.u32 2147483647, %v460_v2 }
 0x2f6   :  { %v469_v61 = vpop.f32.mrb[3].mxu0  ;;  %v475_v0 = vadd.f32 %v1717_v60, %v1607_v62  ;;  %v483_v8 = vadd.f32 1.0, %v479_v3 }
 0x2f7   :  { %v470_v1 = vadd.f32 %v1607_v62, %v469_v61  ;;  %v482_v12 = vadd.f32 1.0, %v478_v7 }
 0x2f8   :  { %v481_v5 = vand.u32 2147483647, %v475_v0  ;;  %1897 = vrcp.f32 %v483_v8 }
 0x2f9   :  { %v480_v6 = vand.u32 2147483647, %v470_v1 }
 0x2fa   :  { %v485_v9 = vadd.f32 1.0, %v481_v5 }
 0x2fb   :  { %v484_v11 = vadd.f32 1.0, %v480_v6 }
 0x2fc   :  { %1899 = vrcp.f32 %v485_v9  ;;  %v899_v9 = vld [vmem:[#allocation16 + $0x18] sm:$0xff] }
 0x2fd   :  { %1901 = vrcp.f32 %v484_v11  ;;  %v900_v11 = vld [vmem:[#allocation16 + $0x20] sm:$0xff] }
 0x2fe   :  { %1903 = vrcp.f32 %v482_v12  ;;  %v1827_v12 = vpack.c.bf16 %v900_v11, %v899_v9 }
 0x302   :  { %v1898_v13 = vpop.eup %1897 }
 0x303   :  { %v2844_v24 = vmul.f32 %v1898_v13, %v465_v63 }
 0x306   :  { %v1900_v15 = vpop.eup %1899 }
 0x307   :  { %v1902_v16 = vpop.eup %1901  ;;  %v2840_v21 = vmul.f32 %v1900_v15, %v475_v0 }
 0x308   :  { %v1904_v17 = vpop.eup %1903  ;;  %v2838_v19 = vmul.f32 %v1902_v16, %v470_v1  ;;  %v901_v16 = vld [vmem:[#allocation16 + $0x28] sm:$0x7] }
 0x309   :  { %v2842_v22 = vmul.f32 %v1904_v17, %v460_v2 }
 0x33a   :  { %v1731_v18 = vpop.f32.mrb[4].mxu1 }
 0x33b   :  { %v657_v20 = vpop.f32.mrb[5].mxu1  ;;  %v674_v25 = vmul.f32 %v1731_v18, %v2838_v19 }
 0x33c   :  { %v1732_v23 = vpop.f32.mrb[6].mxu1  ;;  %v672_v28 = vmul.f32 %v657_v20, %v2842_v22 }
 0x33d   :  { %v675_v26 = vmul.f32 %v1732_v23, %v2840_v21  ;;  %v660_v27 = vpop.f32.mrb[7].mxu1 }
 0x33e   :  { %v673_v29 = vmul.f32 %v660_v27, %v2844_v24 }
 0x33f   :  { %v677_v30 = vpack.c.bf16 %v675_v26, %v674_v25 }
 0x340   :  { %v676_v31 = vpack.c.bf16 %v673_v29, %v672_v28 }
 0x342   :  { %1734 = vmatpush3.bf16.msra.mxu0 %v676_v31 }
 0x343   :  { %1735 = vmatprep.subr.bf16.mxu0 %v2438_v50 }
 0x346   :  { %1736 = vmatpush3.bf16.msra.mxu0 %v677_v30 }
 0x347   :  { %1828 = vmatprep.subr.bf16.mxu0 %v1827_v12 }
 0x349   :  { %1738 = vmatmul.mubr.msk.bf16.vlgmr.msra.gmra.mrb[4].mxu0 %vm691_vm8, %v2851_v32 }
 0x34a   :  { %1830 = vmatpush3.bf16.msra.mxu0 %v1827_v12 }
 0x34b   :  { %1754 = vmatprep.subr.msk.mxu0 %vm516_vm1, %v901_v16 }
 0x34c   :  { %v839_v48 = vpop.permute.xlu0 %838  ;;  %v837_v52 = vpop.permute.xlu1 %836 }
 0x34e   :  { %1755 = vmatpush3.msk.msra.mxu0 %vm516_vm1, %v901_v16 }
 0x34f   :  { %1765 = vmatprep.subr.bf16.mxu0 %v2438_v50 }
 0x350   :  { %v859_v63 = vpop.permute.xlu0 %858  ;;  %v857_v1 = vpop.permute.xlu1 %856 }
 0x41c   :  { %v729_v35 = vpop.f32.mrb[4].mxu0 }
 0x41d   :  { %v730_v36 = vadd.f32 %v729_v35, %v686_v54  ;;  %v1739_v37 = vpop.f32.mrb[5].mxu0 }
 0x41e   :  { %v732_v39 = vpop.f32.mrb[6].mxu0 }
 0x41f   :  { %v742_v40 = vadd.f32 %v2861_v34, %v730_v36  ;;  %v733_v41 = vadd.f32 %v732_v39, %v688_v38  ;;  %v1740_v42 = vpop.f32.mrb[7].mxu0 }
 0x421   :  { %v743_v43 = vadd.f32 %v2861_v34, %v733_v41  ;;  %1747 = vmatprep.mubr.msk.f32.mxu1 %vm509_vm0, %v742_v40 }
 0x423   :  { %1748 = vmatmul.mubr.msk.f32.vlgmr.msra.gmra.mrb[2].mxu1 %vm509_vm0, %v743_v43 }
 0x424   :  { %1761 = vmatprep.mubr.msk.bf16.mxu1 %vm616_vm5, %v2812_v14 }
 0x4f6   :  { %v1749_v45 = vpop.f32.mrb[2].mxu1 }
 0x4f7   :  { %v831_v46 = vadd.f32 %v1749_v45, %v2869_v44  ;;  %v825_v47 = vpop.f32.mrb[3].mxu1 }
 0x4f8   :  { %v826_v51 = vadd.f32 %v2869_v44, %v825_v47 }
 0x4f9   :  { %v843_v54 = vadd.f32 %v839_v48, %v831_v46 }
 0x4fa   :  { %v842_v56 = vadd.f32 %v837_v52, %v826_v51 }
 0x4fb   :  { %v1629_v57 = vmul.f32 -1.442695, %v843_v54 }
 0x4fc   :  { %v1628_v58 = vmul.f32 -1.442695, %v842_v56 }
 0x4fd   :  { %1905 = vpow2.f32 %v1629_v57 }
 0x4fe   :  { %1907 = vpow2.f32 %v1628_v58 }
 0x507   :  { %v1906_v59 = vpop.eup %1905 }
 0x508   :  { %v1908_v60 = vpop.eup %1907  ;;  %v851_v61 = vadd.f32 1.0, %v1906_v59 }
 0x509   :  { %v850_v14 = vadd.f32 1.0, %v1908_v60 }
 0x50a   :  { %1909 = vrcp.f32 %v851_v61 }
 0x50b   :  { %1911 = vrcp.f32 %v850_v14 }
 0x514   :  { %v1910_v62 = vpop.eup %1909 }
 0x515   :  { %v1912_v0 = vpop.eup %1911  ;;  %v863_v2 = vmul.f32 %v1910_v62, %v859_v63  ;;  %v877_v28 = vsub.f32 1.0, %v1910_v62 }
 0x516   :  { %v862_v3 = vmul.f32 %v1912_v0, %v857_v1  ;;  %v876_v18 = vsub.f32 1.0, %v1912_v0 }
 0x517   :  { %868 = vrot.lane.b32.xlu0 %v863_v2, %s2437_s8 }
 0x518   :  { %866 = vrot.lane.b32.xlu1 %v862_v3, %s2437_s8 }
 0x51b   :  { %888 = vrot.lane.b32.xlu0 %v2802_v4, %s2442_s20 }
 0x51f   :  { %890 = vrot.lane.b32.xlu0 %v2807_v10, %s2442_s20 }
 0x589   :  { %v869_v5 = vpop.permute.xlu0 %868 }
 0x58a   :  { %v867_v6 = vpop.permute.xlu1 %866  ;;  %v873_v8 = vadd.f32 %v869_v5, %v831_v46 }
 0x58b   :  { %v872_v7 = vadd.f32 %v867_v6, %v826_v51 }
 0x58d   :  { %1913 = vtanh.f32 %v872_v7  ;;  %v2882_v17 = vpop.permute.xlu0 %888 }
 0x58e   :  { %1915 = vtanh.f32 %v873_v8  ;;  %v894_v23 = vmul.f32 %v1912_v0, %v2882_v17 }
 0x591   :  { %v2885_v26 = vpop.permute.xlu0 %890 }
 0x592   :  { %v895_v30 = vmul.f32 %v1910_v62, %v2885_v26 }
 0x597   :  { %v1914_v13 = vpop.eup %1913 }
 0x598   :  { %880 = vrot.lane.b32.xlu1 %v1914_v13, %s2436_s22  ;;  %v1916_v15 = vpop.eup %1915 }
 0x59c   :  { %882 = vrot.lane.b32.xlu1 %v1916_v15, %s2436_s22 }
 0x60a   :  { %v881_v20 = vpop.permute.xlu1 %880 }
 0x60b   :  { %v886_v25 = vmul.f32 %v881_v20, %v876_v18  ;;  %v1248_v20 = vld [vmem:[#allocation23] sm:$0xff] }
 0x60d   :  { %v2887_v27 = vadd.f32 %v894_v23, %v886_v25  ;;  %v1249_v23 = vld [vmem:[#allocation23 + $0x8] sm:$0xff]  ;;  %v1250_v25 = vld [vmem:[#allocation23 + $0x10] sm:$0xff] }
 0x60e   :  { %v883_v29 = vpop.permute.xlu1 %882 }
 0x60f   :  { %v887_v31 = vmul.f32 %v883_v29, %v877_v28  ;;  %904 = vrot.lane.b32.xlu1 %v2887_v27, %s2436_s22  ;;  %v1835_v28 = vpack.c.bf16 %v1249_v23, %v1248_v20  ;;  %v1251_v29 = vld [vmem:[#allocation23 + $0x18] sm:$0xff] }
 0x611   :  { %v2892_v35 = vadd.f32 %v895_v30, %v887_v31  ;;  %v1839_v30 = vpack.c.bf16 %v1251_v29, %v1250_v25 }
 0x613   :  { %906 = vrot.lane.b32.xlu0 %v2892_v35, %s2436_s22 }
 0x681   :  { %v905_v36 = vpop.permute.xlu1 %904 }
 0x682   :  { %1756 = vmatprep.mubr.msk.f32.mxu0 %vm509_vm0, %v905_v36 }
 0x685   :  { %v907_v37 = vpop.permute.xlu0 %906 }
 0x686   :  { %1757 = vmatmul.mubr.msk.f32.vlgmr.msra.gmra.mrb[8].mxu0 %vm509_vm0, %v907_v37  ;;  %v1252_v37 = vld [vmem:[#allocation23 + $0x20] sm:$0x3f] }
 0x687   :  { %1769 = vmatprep.mubr.msk.bf16.mxu0 %vm2439_vm7, %v2438_v50 }
 0x759   :  { %v1758_v38 = vpop.f32.mrb[8].mxu0 }
 0x75a   :  { %1052 = vrot.lane.b32.xlu0 %v1758_v38, %s2436_s22  ;;  %v981_v39 = vpop.f32.mrb[9].mxu0  ;;  %v991_v41 = vadd.f32 %v1758_v38, %v2830_v55 }
 0x75b   :  { %v992_v40 = vpack.c.bf16 %v1758_v38, %v981_v39  ;;  %1050 = vrot.lane.b32.xlu1 %v981_v39, %s2436_s22  ;;  %v990_v42 = vadd.f32 %v981_v39, %v2830_v55 }
 0x75d   :  { %1759 = vmatprep.subr.bf16.mxu1 %v992_v40 }
 0x75e   :  { %1184 = vrot.lane.b32.xlu0 %v991_v41, %s2440_s4  ;;  %1760 = vmatpush3.bf16.msra.mxu1 %v992_v40 }
 0x75f   :  { %1182 = vrot.lane.b32.xlu1 %v990_v42, %s2440_s4  ;;  %1832 = vmatprep.subr.bf16.mxu1 %v2826_v53 }
 0x761   :  { %1762 = vmatmul.mubr.msk.bf16.vlgmr.msra.gmra.mrb[8].mxu1 %vm616_vm5, %v2818_v49 }
 0x762   :  { %1204 = vrot.lane.b32.xlu0 %v991_v41, %s2441_s13  ;;  %1834 = vmatpush3.bf16.msra.mxu1 %v2826_v53 }
 0x763   :  { %1202 = vrot.lane.b32.xlu1 %v990_v42, %s2441_s13  ;;  %1777 = vmatprep.subr.msk.mxu1 %vm516_vm1, %v2855_v33 }
 0x766   :  { %1778 = vmatpush3.msk.msra.mxu1 %vm516_vm1, %v2855_v33 }
 0x7cc   :  { %v1053_v57 = vpop.permute.xlu0 %1052 }
 0x7cd   :  { %v1051_v33 = vpop.permute.xlu1 %1050 }
 0x7d0   :  { %v1185_v61 = vpop.permute.xlu0 %1184 }
 0x7d1   :  { %v1183_v62 = vpop.permute.xlu1 %1182 }
 0x7d4   :  { %v1205_v8 = vpop.permute.xlu0 %1204 }
 0x7d5   :  { %v1203_v11 = vpop.permute.xlu1 %1202 }
 0x834   :  { %v1763_v55 = vpop.f32.mrb[8].mxu1 }
 0x835   :  { %v1027_v43 = vpop.f32.mrb[9].mxu1  ;;  %v1044_v46 = vmul.f32 %v1763_v55, %v2838_v19 }
 0x836   :  { %v1764_v45 = vpop.f32.mrb[10].mxu1  ;;  %v1042_v48 = vmul.f32 %v1027_v43, %v2842_v22 }
 0x837   :  { %v1045_v47 = vmul.f32 %v1764_v45, %v2840_v21  ;;  %v1030_v49 = vpop.f32.mrb[11].mxu1 }
 0x838   :  { %v1043_v53 = vmul.f32 %v1030_v49, %v2844_v24 }
 0x839   :  { %v1047_v51 = vpack.c.bf16 %v1045_v47, %v1044_v46 }
 0x83a   :  { %v1046_v52 = vpack.c.bf16 %v1043_v53, %v1042_v48 }
 0x83c   :  { %1766 = vmatpush3.bf16.msra.mxu0 %v1046_v52 }
 0x83d   :  { %1767 = vmatprep.subr.bf16.mxu0 %v2438_v50 }
 0x840   :  { %1768 = vmatpush3.bf16.msra.mxu0 %v1047_v51  ;;  %v1354_v51 = vld [vmem:[#allocation26] sm:$0xff] }
 0x841   :  { %1836 = vmatprep.subr.bf16.mxu0 %v1835_v28 }
 0x843   :  { %1770 = vmatmul.mubr.msk.bf16.vlgmr.msra.gmra.mrb[12].mxu0 %vm691_vm8, %v2851_v32 }
 0x844   :  { %1838 = vmatpush3.bf16.msra.mxu0 %v1835_v28 }
 0x845   :  { %1840 = vmatprep.subr.bf16.mxu0 %v1839_v30 }
 0x848   :  { %1842 = vmatpush3.bf16.msra.mxu0 %v1839_v30 }
 0x849   :  { %1790 = vmatprep.subr.msk.mxu0 %vm1267_vm9, %v1252_v37 }
 0x84c   :  { %1791 = vmatpush3.msk.msra.mxu0 %vm1267_vm9, %v1252_v37 }
 0x916   :  { %v1090_v54 = vpop.f32.mrb[12].mxu0 }
 0x917   :  { %v1091_v56 = vadd.f32 %v1090_v54, %v1051_v33  ;;  %v1771_v19 = vpop.f32.mrb[13].mxu0  ;;  %v1356_v33 = vld [vmem:[#allocation26 + $0x10] sm:$0x7]  ;;  %v1641_v54 = vld [vmem:[#allocation25] ss:$0 sm:$0xff] }
 0x918   :  { %v1093_v21 = vpop.f32.mrb[14].mxu0 }
 0x919   :  { %v1097_v58 = vadd.f32 %v2861_v34, %v1091_v56  ;;  %v1094_v22 = vadd.f32 %v1093_v21, %v1053_v57  ;;  %v1772_v59 = vpop.f32.mrb[15].mxu0 }
 0x91b   :  { %v1098_v24 = vadd.f32 %v2861_v34, %v1094_v22  ;;  %1779 = vmatprep.mubr.msk.f32.mxu1 %vm509_vm0, %v1097_v58 }
 0x91d   :  { %1780 = vmatmul.mubr.msk.f32.vlgmr.msra.gmra.mrb[12].mxu1 %vm509_vm0, %v1098_v24 }
 0x9f0   :  { %v1781_v50 = vpop.f32.mrb[12].mxu1 }
 0x9f1   :  { %v1177_v60 = vadd.f32 %v1781_v50, %v2869_v44  ;;  %v1171_v32 = vpop.f32.mrb[13].mxu1 }
 0x9f2   :  { %v1172_v14 = vadd.f32 %v2869_v44, %v1171_v32  ;;  %v1479_v32 = vld [vmem:[#allocation29] sm:$0xff] }
 0x9f3   :  { %v1189_v63 = vadd.f32 %v1185_v61, %v1177_v60  ;;  %v1480_v61 = vld [vmem:[#allocation29 + $0x8] sm:$0xff] }
 0x9f4   :  { %v1188_v0 = vadd.f32 %v1183_v62, %v1172_v14  ;;  %v1481_v62 = vld [vmem:[#allocation29 + $0x10] sm:$0x7] }
 0x9f5   :  { %v1640_v1 = vmul.f32 -1.442695, %v1189_v63  ;;  %v1645_v63 = vld [vmem:[#allocation28] ss:$0 sm:$0xff] }
 0x9f6   :  { %v1639_v2 = vmul.f32 -1.442695, %v1188_v0 }
 0x9f7   :  { %1917 = vpow2.f32 %v1640_v1 }
 0x9f8   :  { %1919 = vpow2.f32 %v1639_v2 }
 0xa01   :  { %v1918_v3 = vpop.eup %1917 }
 0xa02   :  { %v1920_v34 = vpop.eup %1919  ;;  %v1197_v5 = vadd.f32 1.0, %v1918_v3 }
 0xa03   :  { %v1196_v6 = vadd.f32 1.0, %v1920_v34 }
 0xa04   :  { %1921 = vrcp.f32 %v1197_v5 }
 0xa05   :  { %1923 = vrcp.f32 %v1196_v6 }
 0xa0e   :  { %v1922_v7 = vpop.eup %1921 }
 0xa0f   :  { %v1924_v9 = vpop.eup %1923  ;;  %v1209_v12 = vmul.f32 %v1922_v7, %v1205_v8  ;;  %v1223_v38 = vsub.f32 1.0, %v1922_v7  ;;  %v1235_v41 = vmul.f32 %v1922_v7, %v2892_v35 }
 0xa10   :  { %v1208_v13 = vmul.f32 %v1924_v9, %v1203_v11  ;;  %v1222_v40 = vsub.f32 1.0, %v1924_v9  ;;  %v1234_v43 = vmul.f32 %v1924_v9, %v2887_v27  ;;  %v1355_v27 = vld [vmem:[#allocation26 + $0x8] sm:$0xff] }
 0xa11   :  { %1214 = vrot.lane.b32.xlu0 %v1209_v12, %s2437_s8  ;;  %v1843_v52 = vpack.c.bf16 %v1355_v27, %v1354_v51 }
 0xa12   :  { %1212 = vrot.lane.b32.xlu1 %v1208_v13, %s2437_s8 }
 0xa13   :  { %1844 = vmatprep.subr.bf16.mxu1 %v1843_v52 }
 0xa14   :  { %1846 = vmatpush3.bf16.msra.mxu1 %v1843_v52 }
 0xa15   :  { %1799 = vmatprep.subr.msk.mxu1 %vm516_vm1, %v1356_v33 }
 0xa18   :  { %1800 = vmatpush3.msk.msra.mxu1 %vm516_vm1, %v1356_v33 }
 0xa83   :  { %v1215_v44 = vpop.permute.xlu0 %1214 }
 0xa84   :  { %v1219_v15 = vadd.f32 %v1215_v44, %v1177_v60  ;;  %v1213_v16 = vpop.permute.xlu1 %1212 }
 0xa85   :  { %v1218_v18 = vadd.f32 %v1213_v16, %v1172_v14  ;;  %v1847_v14 = vpack.c.bf16 %v1480_v61, %v1479_v32 }
 0xa86   :  { %1925 = vtanh.f32 %v1219_v15 }
 0xa87   :  { %1927 = vtanh.f32 %v1218_v18  ;;  %1848 = vmatprep.subr.bf16.mxu1 %v1847_v14 }
 0xa90   :  { %v1926_v31 = vpop.eup %1925 }
 0xa91   :  { %v1928_v36 = vpop.eup %1927  ;;  %1228 = vrot.lane.b32.xlu0 %v1926_v31, %s2436_s22 }
 0xa92   :  { %1226 = vrot.lane.b32.xlu1 %v1928_v36, %s2436_s22  ;;  %v1649_v36 = vld [vmem:[#allocation31] ss:$0 sm:$0xff] }
 0xb03   :  { %v1229_v39 = vpop.permute.xlu0 %1228 }
 0xb04   :  { %v1233_v42 = vmul.f32 %v1229_v39, %v1223_v38  ;;  %v1227_v55 = vpop.permute.xlu1 %1226 }
 0xb05   :  { %v1232_v45 = vmul.f32 %v1227_v55, %v1222_v40 }
 0xb06   :  { %v1237_v46 = vadd.f32 %v1235_v41, %v1233_v42 }
 0xb07   :  { %v1236_v47 = vadd.f32 %v1234_v43, %v1232_v45 }
 0xb08   :  { %1242 = vrot.lane.b32.xlu0 %v1237_v46, %s2436_s22 }
 0xb09   :  { %1240 = vrot.lane.b32.xlu1 %v1236_v47, %s2436_s22 }
 0xb7a   :  { %v1243_v49 = vpop.permute.xlu0 %1242 }
 0xb7b   :  { %v1241_v48 = vpop.permute.xlu1 %1240  ;;  %v1247_v35 = vsel %vm509_vm0, %v1243_v49, %v2885_v26 }
 0xb7c   :  { %v1246_v53 = vsel %vm509_vm0, %v1241_v48, %v2882_v17 }
 0xb7d   :  { %1792 = vmatprep.mubr.msk.f32.mxu0 %vm1260_vm10, %v1246_v53 }
 0xb7e   :  { %1793 = vmatmul.mubr.msk.f32.vlgmr.msra.gmra.mrb[10].mxu0 %vm1260_vm10, %v1247_v35 }
 0xc51   :  { %v1794_v56 = vpop.f32.mrb[10].mxu0 }
 0xc52   :  { %v1343_v19 = vadd.f32 %v1794_v56, %v1641_v54  ;;  %v1337_v57 = vpop.f32.mrb[11].mxu0 }
 0xc53   :  { %v1338_v17 = vadd.f32 %v1641_v54, %v1337_v57 }
 0xc54   :  { %v1347_v21 = vand.u32 2147483647, %v1343_v19 }
 0xc55   :  { %v1346_v58 = vand.u32 2147483647, %v1338_v17 }
 0xc56   :  { %v1349_v26 = vadd.f32 1.0, %v1347_v21 }
 0xc57   :  { %v1348_v22 = vadd.f32 1.0, %v1346_v58 }
 0xc58   :  { %1929 = vrcp.f32 %v1349_v26 }
 0xc59   :  { %1931 = vrcp.f32 %v1348_v22 }
 0xc62   :  { %v1930_v59 = vpop.eup %1929 }
 0xc63   :  { %v1932_v24 = vpop.eup %1931  ;;  %v1353_v60 = vmul.f32 %v1930_v59, %v1343_v19 }
 0xc64   :  { %v1351_v50 = vmul.f32 %v1932_v24, %v1338_v17 }
 0xc66   :  { %1801 = vmatprep.mubr.msk.f32.mxu1 %vm509_vm0, %v1351_v50 }
 0xc67   :  { %1802 = vmatmul.mubr.msk.f32.vlgmr.msra.gmra.mrb[14].mxu1 %vm509_vm0, %v1353_v60 }
 0xc68   :  { %1810 = vmatprep.mubr.msk.f32.mxu1 %vm509_vm0, %v2802_v4  ;;  %1850 = vmatpush3.bf16.msra.mxu1 %v1847_v14 }
 0xc69   :  { %1808 = vmatprep.subr.msk.mxu1 %vm516_vm1, %v1481_v62 }
 0xc6c   :  { %1809 = vmatpush3.msk.msra.mxu1 %vm516_vm1, %v1481_v62 }
 0xc6d   :  { %1811 = vmatmul.mubr.msk.f32.vlgmr.msra.gmra.mrb[16].mxu1 %vm509_vm0, %v2807_v10 }
 0xd3a   :  { %v1803_v0 = vpop.f32.mrb[14].mxu1 }
 0xd3b   :  { %v1445_v1 = vadd.f32 %v1803_v0, %v1645_v63  ;;  %v1439_v2 = vpop.f32.mrb[15].mxu1 }
 0xd3c   :  { %v1440_v3 = vadd.f32 %v1645_v63, %v1439_v2 }
 0xd3d   :  { %v1449_v34 = vand.u32 2147483647, %v1445_v1 }
 0xd3e   :  { %v1448_v4 = vand.u32 2147483647, %v1440_v3 }
 0xd3f   :  { %v1451_v5 = vadd.f32 1.0, %v1449_v34 }
 0xd40   :  { %v1450_v6 = vadd.f32 1.0, %v1448_v4  ;;  %v1812_v13 = vpop.f32.mrb[16].mxu1 }
 0xd41   :  { %1933 = vrcp.f32 %v1451_v5  ;;  %v1558_v44 = vpop.f32.mrb[17].mxu1  ;;  %v1564_v37 = vadd.f32 %v1812_v13, %v1649_v36 }
 0xd42   :  { %1935 = vrcp.f32 %v1450_v6  ;;  %v1559_v38 = vadd.f32 %v1649_v36, %v1558_v44 }
 0xd43   :  { %v1568_v39 = vand.u32 2147483647, %v1564_v37 }
 0xd44   :  { %v1567_v40 = vand.u32 2147483647, %v1559_v38 }
 0xd45   :  { %v1570_v41 = vadd.f32 1.0, %v1568_v39 }
 0xd46   :  { %v1569_v42 = vadd.f32 1.0, %v1567_v40 }
 0xd4b   :  { %v1934_v7 = vpop.eup %1933 }
 0xd4c   :  { %v1936_v8 = vpop.eup %1935  ;;  %v1455_v9 = vmul.f32 %v1934_v7, %v1445_v1 }
 0xd4d   :  { %v1453_v11 = vmul.f32 %v1936_v8, %v1440_v3 }
 0xd4e   :  { %v1460_v12 = vsel %vm1456_vm11, %v1455_v9, -inf }
 0xd4f   :  { %1461 = vmax.xlane.f32.xlu0 %v1460_v12  ;;  %v1457_v10 = vsel %vm1456_vm11, %v1453_v11, -inf }
 0xd50   :  { %1458 = vmax.xlane.f32.xlu1 %v1457_v10 }
 0xddc   :  { %v1462_v15 = vpop.xlane.xlu0 %1461 }
 0xddd   :  { %v1464_v16 = vsub.f32 %v1455_v9, %v1462_v15  ;;  %v1459_v18 = vpop.xlane.xlu1 %1458 }
 0xdde   :  { %v1463_v20 = vsub.f32 %v1453_v11, %v1459_v18 }
 0xddf   :  { %v1467_v23 = vmul.f32 1.442695, %v1464_v16 }
 0xde0   :  { %v1465_v25 = vmul.f32 1.442695, %v1463_v20 }
 0xde1   :  { %1937 = vpow2.f32 %v1467_v23 }
 0xde2   :  { %1939 = vpow2.f32 %v1465_v25 }
 0xde3   :  { %1941 = vrcp.f32 %v1570_v41 }
 0xde4   :  { %1943 = vrcp.f32 %v1569_v42 }
 0xdeb   :  { %v1938_v28 = vpop.eup %1937 }
 0xdec   :  { %v1940_v29 = vpop.eup %1939  ;;  %v1472_v30 = vsel %vm1456_vm11, %v1938_v28, 0.0 }
 0xded   :  { %1473 = vadd.xlane.f32.xlu1 %v1472_v30  ;;  %v1469_v31 = vsel %vm1456_vm11, %v1940_v29, 0.0  ;;  %v1942_v45 = vpop.eup %1941 }
 0xdee   :  { %1470 = vadd.xlane.f32.xlu0 %v1469_v31  ;;  %v1944_v46 = vpop.eup %1943  ;;  %v1574_v48 = vmul.f32 %v1942_v45, %v1564_v37 }
 0xdef   :  { %v1572_v35 = vmul.f32 %v1944_v46, %v1559_v38 }
 0xe7a   :  { %v1474_v55 = vpop.xlane.xlu1 %1473 }
 0xe7b   :  { %1945 = vrcp.f32 %v1474_v55  ;;  %v1471_v43 = vpop.xlane.xlu0 %1470 }
 0xe7c   :  { %1947 = vrcp.f32 %v1471_v43 }
 0xe85   :  { %v1946_v47 = vpop.eup %1945 }
 0xe86   :  { %v1948_v49 = vpop.eup %1947  ;;  %v1478_v53 = vmul.f32 %v1946_v47, %v1938_v28 }
 0xe87   :  { %v1477_v51 = vmul.f32 %v1948_v49, %v1940_v29 }
 0xe88   :  { %v1576_v27 = vmul.f32 %v1574_v48, %v1478_v53 }
 0xe89   :  { %v1575_v52 = vmul.f32 %v1572_v35, %v1477_v51 }
 0xe8a   :  { %1578 = vst.msk [vmem:[#allocation32 + $0x8] sm:$0xff] %vm1456_vm11, %v1576_v27 }
 0xe8b   :  { %1577 = vst.msk [vmem:[#allocation32] sm:$0xff] %vm1456_vm11, %v1575_v52 }
 0xe8c   :  { %2378 = shalt.err (!%p2375_p2)
}
 0xe8d   :  { %s3012_s21 = sld [smem:[#allocation50_spill]] }
 0xe93   :  { %s2379_s1 = scalar_lea.hbm %s3012_s21, 256 }
 0xe94   :  { %p2380_p3 = scmp.ne.s32.totalorder %s3012_s21, %s2379_s1  ;;  %p2383_p4 = scmp.lt.u32.totalorder %s2379_s1, %s3012_s21 }
 0xe96   :  { %p2385_p5 = pnand %p2383_p4, %p2380_p3 }
 0xe98   :  { %2388 = shalt.err (!%p2385_p5)
}
 0xe99   :  { %1590 = dma.vmem_to_hbm [thread:$0]  %s1585_s17, 256, %s3012_s21, [#allocation4], %s2412_s26, %s2412_s26, %s2413_s27  }
 0xe9a   :  { %2409 = dma.done.wait [#allocation4], 256  }
 0xe9b   :  { %2410 = vsyncadd [#allocation4], 4294967040 }
 0xe9c   :  { %1594 = vsyncpa [#allocation3], 1 }
 0xe9d   :  { %1595 = vsyncpa [#allocation6], 1 }
 0xe9e   :  { %1596 = vsyncpa [#allocation9], 1 }
 0xe9f   :  { %1597 = vsyncpa [#allocation12], 1 }
 0xea0   :  { %1598 = vsyncpa [#allocation15], 1 }
 0xea1   :  { %1599 = vsyncpa [#allocation18], 1 }
 0xea2   :  { %1600 = vsyncpa [#allocation21], 1 }
 0xea3   :  { %1601 = vsyncpa [#allocation24], 1 }
 0xea4   :  { %1602 = vsyncpa [#allocation27], 1 }
 0xea5   :  { %1603 = vsyncpa [#allocation30], 1 }
 0xea6   :  { %1604 = vsyncpa [#allocation4], 1 }

</bundles_post_ra>
